<compile_context>
chip_gen: v5e
topology: v5e:2x2
jax: 0.10.0
libtpu: 0.0.40
codegen_flags: <defaults>
</compile_context>

<pallas_src>
import jax
import jax.numpy as jnp
from jax.experimental import pallas as pl
from jax.experimental.pallas import tpu as pltpu

# -------- model config (small shapes consistent with args.hidden_size / num_heads / trm_num)
B, T, H = 2, 8, 32
NUM_HEADS = 2
TRM_NUM = 2
HEAD_DIM = H // NUM_HEADS
EPS = 1e-8


def _layernorm(x, w, b):
    mean = jnp.mean(x, axis=-1, keepdims=True)
    var = jnp.mean(jnp.square(x - mean), axis=-1, keepdims=True)
    return (x - mean) * jax.lax.rsqrt(var + EPS) * w + b


def sasrec_kernel(x_ref, mask_ref,
                  aln_w_ref, aln_b_ref,
                  wq_t_ref, bq_ref,
                  wkv_t_ref, bkv_ref,
                  wo_t_ref, bo_ref,
                  fln_w_ref, fln_b_ref,
                  w1_t_ref, b1_ref, w2_t_ref, b2_ref,
                  lln_w_ref, lln_b_ref,
                  out_ref,
                  x_scr):
    """Grid = (batch_blocks, TRM_NUM).  One grid step = one transformer layer applied to a
    block of B_BLK sequences flattened to (B_BLK*T, H) rows.  The running activation is
    carried across the (arbitrary) layer axis in VMEM scratch; per-layer weight refs are
    already sliced to the current layer by their BlockSpecs."""
    l = pl.program_id(1)
    rows, _ = x_ref.shape
    b_blk = rows // T
    mask = mask_ref[...]                              # (rows, 1): 1.0 valid item, 0.0 padding

    @pl.when(l == 0)
    def _init():                                      # seqs *= ~timeline_mask
        x_scr[...] = x_ref[...] * mask

    x = x_scr[...]                                    # (rows, H)

    # ---- self-attention block: Q = LN(x); K = V = x (full attention, matching reference)
    q_in = _layernorm(x, aln_w_ref[...], aln_b_ref[...])
    # Q projection (1/sqrt(head_dim) folded into wq_t / bq host-side).
    q = jnp.dot(q_in, wq_t_ref[...], preferred_element_type=jnp.float32) + bq_ref[...]
    # Fused K/V projection: one (rows, H) @ (H, 2H) GEMM (same input x for both).
    kv = jnp.dot(x, wkv_t_ref[...], preferred_element_type=jnp.float32) + bkv_ref[...]
    k = kv[:, :H]
    v = kv[:, H:]

    # Per-sequence views: split of the leading (row) dim only -> layout-friendly reshape.
    q3 = q.reshape(b_blk, T, H)
    k3 = k.reshape(b_blk, T, H)
    v3 = v.reshape(b_blk, T, H)

    # Heads stay contiguous in the lane dim; static per-head column slices, no transposes.
    head_out = []
    for h in range(NUM_HEADS):                        # static, tiny trip count
        sl = slice(h * HEAD_DIM, (h + 1) * HEAD_DIM)
        s = jnp.einsum('bqd,bkd->bqk', q3[:, :, sl], k3[:, :, sl],
                       preferred_element_type=jnp.float32)
        s = s - jnp.max(s, axis=-1, keepdims=True)
        p = jnp.exp(s)
        p = p * pl.reciprocal(jnp.sum(p, axis=-1, keepdims=True), approx=True)
        head_out.append(jnp.einsum('bqk,bkd->bqd', p, v3[:, :, sl],
                                   preferred_element_type=jnp.float32))
    ctx = jnp.concatenate(head_out, axis=-1).reshape(rows, H)

    # Single output-projection GEMM over all heads.
    attn = jnp.dot(ctx, wo_t_ref[...], preferred_element_type=jnp.float32) + bo_ref[...]
    x = q_in + attn                                   # seqs = Q + mha_outputs

    # ---- point-wise feed forward (Conv1d k=1 == dense); residual from the LN output.
    # TODO(synk): dropout layers are identity in eval mode; training-mode dropout not modeled.
    y = _layernorm(x, fln_w_ref[...], fln_b_ref[...])
    h1 = jnp.maximum(
        jnp.dot(y, w1_t_ref[...], preferred_element_type=jnp.float32) + b1_ref[...], 0.0)
    h2 = jnp.dot(h1, w2_t_ref[...], preferred_element_type=jnp.float32) + b2_ref[...]
    x = (h2 + y) * mask                               # residual + re-mask padded positions

    x_scr[...] = x                                    # carry activation to next layer step

    @pl.when(l == pl.num_programs(1) - 1)
    def _final():
        out_ref[...] = _layernorm(x, lln_w_ref[...], lln_b_ref[...])


def sasrec_forward(seqs, log_seqs, kp, b_blk=None):
    """seqs: (B, T, H) float32, log_seqs: (B, T) int32 item ids (0 = padding)."""
    Bsz, Tlen, Hd = seqs.shape
    if b_blk is None:
        b_blk = Bsz          # toy: whole batch per step; at production sizes pick 32-128
    assert Bsz % b_blk == 0
    n_bblk = Bsz // b_blk
    r_blk = b_blk * Tlen

    # Activations flattened host-side to (B*T, H): kernel GEMMs see M = B_BLK*T rows with
    # no in-kernel (B, T, H) relayout.  The mask is a narrow (B*T, 1) column instead of a
    # broadcast (B, T, H) slab.
    x2d = seqs.reshape(Bsz * Tlen, Hd).astype(jnp.float32)
    mask2d = (log_seqs != 0).astype(jnp.float32).reshape(Bsz * Tlen, 1)

    act_spec = pl.BlockSpec((r_blk, Hd), lambda b, l: (b, 0))
    mask_spec = pl.BlockSpec((r_blk, 1), lambda b, l: (b, 0))

    def layer_spec(arr):
        # One layer's weights per grid step (leading layer dim squeezed).  Default double
        # buffering prefetches layer l+1 while layer l computes -> at most ~2 layers of
        # weights VMEM-resident (fits v7x's 64 MiB budget at production H).
        return pl.BlockSpec((None,) + arr.shape[1:],
                            lambda b, l, nd=arr.ndim - 1: (l,) + (0,) * nd)

    def resident(arr):
        return pl.BlockSpec(arr.shape, lambda b, l, nd=arr.ndim: (0,) * nd)

    per_layer = [kp['aln_w'], kp['aln_b'],
                 kp['wq_t'], kp['bq'],
                 kp['wkv_t'], kp['bkv'],
                 kp['wo_t'], kp['bo'],
                 kp['fln_w'], kp['fln_b'],
                 kp['w1_t'], kp['b1'], kp['w2_t'], kp['b2']]
    final_ln = [kp['lln_w'], kp['lln_b']]

    # Advisory cost hint so XLA schedules surrounding ops (embedding lookup, loss) sensibly.
    rows = Bsz * Tlen
    flops = TRM_NUM * rows * (12 * Hd * Hd + 4 * Tlen * Hd)
    transcendentals = TRM_NUM * Bsz * NUM_HEADS * Tlen * Tlen + rows * (2 * TRM_NUM + 1)
    wbytes = sum(int(w.size) * 4 for w in per_layer + final_ln)
    cost = pl.CostEstimate(flops=int(flops),
                           transcendentals=int(transcendentals),
                           bytes_accessed=int((2 * rows * Hd + rows) * 4 + wbytes))

    out2d = pl.pallas_call(
        sasrec_kernel,
        out_shape=jax.ShapeDtypeStruct((Bsz * Tlen, Hd), jnp.float32),
        grid=(n_bblk, TRM_NUM),
        in_specs=[act_spec, mask_spec]
                 + [layer_spec(w) for w in per_layer]
                 + [resident(w) for w in final_ln],
        out_specs=act_spec,
        scratch_shapes=[pltpu.VMEM((r_blk, Hd), jnp.float32)],
        compiler_params=pltpu.CompilerParams(
            dimension_semantics=("parallel", "arbitrary")),  # batch blocks -> both v7x TCs
        cost_estimate=cost,
    )(x2d, mask2d, *per_layer, *final_ln)
    return out2d.reshape(Bsz, Tlen, Hd)


def init_params(key):
    """Deterministic synthetic parameters with PyTorch-module shapes (raw, untransposed)."""
    L = TRM_NUM
    keys = jax.random.split(key, 14)

    def rnd(k, shape, scale=0.1):
        return jax.random.normal(k, shape, dtype=jnp.float32) * scale

    return dict(
        in_proj_w=rnd(keys[0], (L, 3 * H, H)),        # MultiheadAttention.in_proj_weight
        in_proj_b=rnd(keys[1], (L, 3 * H), 0.02),     # MultiheadAttention.in_proj_bias
        out_proj_w=rnd(keys[2], (L, H, H)),           # out_proj.weight
        out_proj_b=rnd(keys[3], (L, H), 0.02),
        conv1_w=rnd(keys[4], (L, H, H)),              # Conv1d(H,H,1).weight squeezed
        conv1_b=rnd(keys[5], (L, H), 0.02),
        conv2_w=rnd(keys[6], (L, H, H)),
        conv2_b=rnd(keys[7], (L, H), 0.02),
        aln_w=1.0 + rnd(keys[8], (L, H), 0.05),
        aln_b=rnd(keys[9], (L, H), 0.02),
        fln_w=1.0 + rnd(keys[10], (L, H), 0.05),
        fln_b=rnd(keys[11], (L, H), 0.02),
        lln_w=1.0 + rnd(keys[12], (H,), 0.05),
        lln_b=rnd(keys[13], (H,), 0.02),
    )


def pack_kernel_params(p):
    """Host-side weight prep: transpose to x @ W.T form, fuse K/V, fold softmax scale into Q."""
    L = TRM_NUM
    scale = 1.0 / (HEAD_DIM ** 0.5)
    wq = p['in_proj_w'][:, 0:H, :]
    wk = p['in_proj_w'][:, H:2 * H, :]
    wv = p['in_proj_w'][:, 2 * H:, :]
    bq = p['in_proj_b'][:, 0:H]
    bk = p['in_proj_b'][:, H:2 * H]
    bv = p['in_proj_b'][:, 2 * H:]
    t = lambda w: jnp.transpose(w, (0, 2, 1))   # (L, H_in, H_out)
    return dict(
        aln_w=p['aln_w'].reshape(L, 1, H), aln_b=p['aln_b'].reshape(L, 1, H),
        wq_t=t(wq) * scale,                                          # scale folded into Q weight
        bq=(bq * scale).reshape(L, 1, H),                            # ... and Q bias
        wkv_t=jnp.concatenate([t(wk), t(wv)], axis=2),               # fused (L, H, 2H) K/V weight
        bkv=jnp.concatenate([bk, bv], axis=1).reshape(L, 1, 2 * H),
        wo_t=t(p['out_proj_w']), bo=p['out_proj_b'].reshape(L, 1, H),
        fln_w=p['fln_w'].reshape(L, 1, H), fln_b=p['fln_b'].reshape(L, 1, H),
        w1_t=t(p['conv1_w']), b1=p['conv1_b'].reshape(L, 1, H),
        w2_t=t(p['conv2_w']), b2=p['conv2_b'].reshape(L, 1, H),
        lln_w=p['lln_w'].reshape(1, H), lln_b=p['lln_b'].reshape(1, H),
    )


def sasrec_reference(seqs, log_seqs, p):
    """Pure-JAX reference mirroring the PyTorch forward (eval mode), from raw params."""
    hp = jax.lax.Precision.HIGHEST
    mask = (log_seqs != 0).astype(jnp.float32)[..., None]
    x = seqs * mask
    scale = 1.0 / (HEAD_DIM ** 0.5)
    for i in range(TRM_NUM):
        q_in = _layernorm(x, p['aln_w'][i], p['aln_b'][i])
        wq = p['in_proj_w'][i, 0:H]
        wk = p['in_proj_w'][i, H:2 * H]
        wv = p['in_proj_w'][i, 2 * H:]
        bq = p['in_proj_b'][i, 0:H]
        bk = p['in_proj_b'][i, H:2 * H]
        bv = p['in_proj_b'][i, 2 * H:]
        q = jnp.einsum('bth,oh->bto', q_in, wq, precision=hp) + bq
        k = jnp.einsum('bth,oh->bto', x, wk, precision=hp) + bk
        v = jnp.einsum('bth,oh->bto', x, wv, precision=hp) + bv
        qh = q.reshape(B, T, NUM_HEADS, HEAD_DIM)
        kh = k.reshape(B, T, NUM_HEADS, HEAD_DIM)
        vh = v.reshape(B, T, NUM_HEADS, HEAD_DIM)
        s = jnp.einsum('bqnd,bknd->bnqk', qh * scale, kh, precision=hp)
        pr = jax.nn.softmax(s, axis=-1)
        oh = jnp.einsum('bnqk,bknd->bqnd', pr, vh, precision=hp).reshape(B, T, H)
        attn = jnp.einsum('bth,oh->bto', oh, p['out_proj_w'][i], precision=hp) + p['out_proj_b'][i]
        x = q_in + attn
        y = _layernorm(x, p['fln_w'][i], p['fln_b'][i])
        h1 = jax.nn.relu(jnp.einsum('bth,oh->bto', y, p['conv1_w'][i], precision=hp) + p['conv1_b'][i])
        h2 = jnp.einsum('bth,oh->bto', h1, p['conv2_w'][i], precision=hp) + p['conv2_b'][i]
        x = (h2 + y) * mask
    return _layernorm(x, p['lln_w'], p['lln_b'])


if __name__ == "__main__":
    key = jax.random.PRNGKey(0)
    k_param, k_seq, k_ids = jax.random.split(key, 3)
    raw_params = init_params(k_param)
    kernel_params = pack_kernel_params(raw_params)

    seqs = jax.random.normal(k_seq, (B, T, H), dtype=jnp.float32)
    log_seqs = jax.random.randint(k_ids, (B, T), 1, 100, dtype=jnp.int32)
    log_seqs = log_seqs.at[0, :3].set(0).at[1, :1].set(0)  # deterministic padding positions

    out = jax.block_until_ready(sasrec_forward(seqs, log_seqs, kernel_params))

    ref = sasrec_reference(seqs, log_seqs, raw_params)
    assert out.shape == (B, T, H)
    assert bool(jnp.all(jnp.isfinite(out)))
    max_err = float(jnp.max(jnp.abs(out - ref)))
    assert max_err < 1e-2, f"mismatch vs reference: {max_err}"

    print("KERNEL_OK")
</pallas_src>

<mosaic_0001>
module attributes {stable_mosaic.version = 11 : i64} {
  func.func @sasrec_kernel(%arg0: i32, %arg1: i32, %arg2: memref<16x32xf32, #tpu.memory_space<vmem>>, %arg3: memref<16x1xf32, #tpu.memory_space<vmem>>, %arg4: memref<1x1x32xf32, #tpu.memory_space<vmem>>, %arg5: memref<1x1x32xf32, #tpu.memory_space<vmem>>, %arg6: memref<1x32x32xf32, #tpu.memory_space<vmem>>, %arg7: memref<1x1x32xf32, #tpu.memory_space<vmem>>, %arg8: memref<1x32x64xf32, #tpu.memory_space<vmem>>, %arg9: memref<1x1x64xf32, #tpu.memory_space<vmem>>, %arg10: memref<1x32x32xf32, #tpu.memory_space<vmem>>, %arg11: memref<1x1x32xf32, #tpu.memory_space<vmem>>, %arg12: memref<1x1x32xf32, #tpu.memory_space<vmem>>, %arg13: memref<1x1x32xf32, #tpu.memory_space<vmem>>, %arg14: memref<1x32x32xf32, #tpu.memory_space<vmem>>, %arg15: memref<1x1x32xf32, #tpu.memory_space<vmem>>, %arg16: memref<1x32x32xf32, #tpu.memory_space<vmem>>, %arg17: memref<1x1x32xf32, #tpu.memory_space<vmem>>, %arg18: memref<1x32xf32, #tpu.memory_space<vmem>>, %arg19: memref<1x32xf32, #tpu.memory_space<vmem>>, %arg20: memref<16x32xf32, #tpu.memory_space<vmem>>, %arg21: memref<16x32xf32, #tpu.memory_space<vmem>>) attributes {dimension_semantics = [#tpu.dimension_semantics<parallel>, #tpu.dimension_semantics<arbitrary>], iteration_bounds = array<i64: 1, 2>, scalar_prefetch = 0 : i64, scratch_operands = 1 : i64, tpu.core_type = #tpu.core_type<tc>, window_params = [{transform_indices = @transform_0, window_bounds = array<i64: 16, 32>}, {transform_indices = @transform_1, window_bounds = array<i64: 16, 1>}, {transform_indices = @transform_2, window_bounds = array<i64: 1, 1, 32>}, {transform_indices = @transform_3, window_bounds = array<i64: 1, 1, 32>}, {transform_indices = @transform_4, window_bounds = array<i64: 1, 32, 32>}, {transform_indices = @transform_5, window_bounds = array<i64: 1, 1, 32>}, {transform_indices = @transform_6, window_bounds = array<i64: 1, 32, 64>}, {transform_indices = @transform_7, window_bounds = array<i64: 1, 1, 64>}, {transform_indices = @transform_8, window_bounds = array<i64: 1, 32, 32>}, {transform_indices = @transform_9, window_bounds = array<i64: 1, 1, 32>}, {transform_indices = @transform_10, window_bounds = array<i64: 1, 1, 32>}, {transform_indices = @transform_11, window_bounds = array<i64: 1, 1, 32>}, {transform_indices = @transform_12, window_bounds = array<i64: 1, 32, 32>}, {transform_indices = @transform_13, window_bounds = array<i64: 1, 1, 32>}, {transform_indices = @transform_14, window_bounds = array<i64: 1, 32, 32>}, {transform_indices = @transform_15, window_bounds = array<i64: 1, 1, 32>}, {pipeline_mode = #tpu.pipeline_mode<synchronous>, transform_indices = @transform_16, window_bounds = array<i64: 1, 32>}, {pipeline_mode = #tpu.pipeline_mode<synchronous>, transform_indices = @transform_17, window_bounds = array<i64: 1, 32>}, {transform_indices = @transform_18, window_bounds = array<i64: 16, 32>}]} {
    %c0 = arith.constant 0 : index
    %c0_0 = arith.constant 0 : index
    %0 = vector.load %arg3[%c0, %c0_0] : memref<16x1xf32, #tpu.memory_space<vmem>>, vector<16x1xf32>
    %c0_i32 = arith.constant 0 : i32
    %1 = arith.cmpi eq, %arg1, %c0_i32 : i32
    %2 = arith.extui %1 : i1 to i32
    %c0_i32_1 = arith.constant 0 : i32
    %3 = arith.cmpi ne, %2, %c0_i32_1 : i32
    scf.if %3 {
      %c0_72 = arith.constant 0 : index
      %c0_73 = arith.constant 0 : index
      %139 = vector.load %arg2[%c0_72, %c0_73] : memref<16x32xf32, #tpu.memory_space<vmem>>, vector<16x32xf32>
      %140 = vector.broadcast %0 : vector<16x1xf32> to vector<16x32xf32>
      %141 = arith.mulf %139, %140 : vector<16x32xf32>
      %c0_74 = arith.constant 0 : index
      %c0_75 = arith.constant 0 : index
      %142 = vector.load %arg21[%c0_74, %c0_75] : memref<16x32xf32, #tpu.memory_space<vmem>>, vector<16x32xf32>
      tpu.vector_store %arg21[%c0_74, %c0_75], %141 {strides = array<i32>} : memref<16x32xf32, #tpu.memory_space<vmem>>, vector<16x32xf32>,
    } else {
    }
    %c0_2 = arith.constant 0 : index
    %c0_3 = arith.constant 0 : index
    %4 = vector.load %arg21[%c0_2, %c0_3] : memref<16x32xf32, #tpu.memory_space<vmem>>, vector<16x32xf32>
    %c0_4 = arith.constant 0 : index
    %c0_5 = arith.constant 0 : index
    %c0_6 = arith.constant 0 : index
    %5 = vector.load %arg4[%c0_4, %c0_5, %c0_6] : memref<1x1x32xf32, #tpu.memory_space<vmem>>, vector<1x1x32xf32>
    %6 = vector.shape_cast %5 : vector<1x1x32xf32> to vector<1x32xf32>
    %c0_7 = arith.constant 0 : index
    %c0_8 = arith.constant 0 : index
    %c0_9 = arith.constant 0 : index
    %7 = vector.load %arg5[%c0_7, %c0_8, %c0_9] : memref<1x1x32xf32, #tpu.memory_space<vmem>>, vector<1x1x32xf32>
    %8 = vector.shape_cast %7 : vector<1x1x32xf32> to vector<1x32xf32>
    %cst = arith.constant dense<0.000000e+00> : vector<16xf32>
    %9 = vector.multi_reduction <add>, %4, %cst [1] : vector<16x32xf32> to vector<16xf32>
    %10 = vector.shape_cast %9 : vector<16xf32> to vector<16x1xf32>
    %cst_10 = arith.constant 3.200000e+01 : f32
    %11 = vector.broadcast %cst_10 : f32 to vector<16x1xf32>
    %12 = arith.divf %10, %11 : vector<16x1xf32>
    %13 = vector.broadcast %12 : vector<16x1xf32> to vector<16x32xf32>
    %14 = arith.subf %4, %13 : vector<16x32xf32>
    %15 = arith.mulf %14, %14 : vector<16x32xf32>
    %cst_11 = arith.constant dense<0.000000e+00> : vector<16xf32>
    %16 = vector.multi_reduction <add>, %15, %cst_11 [1] : vector<16x32xf32> to vector<16xf32>
    %17 = vector.shape_cast %16 : vector<16xf32> to vector<16x1xf32>
    %cst_12 = arith.constant 3.200000e+01 : f32
    %18 = vector.broadcast %cst_12 : f32 to vector<16x1xf32>
    %19 = arith.divf %17, %18 : vector<16x1xf32>
    %20 = vector.broadcast %12 : vector<16x1xf32> to vector<16x32xf32>
    %21 = arith.subf %4, %20 : vector<16x32xf32>
    %cst_13 = arith.constant 9.99999993E-9 : f32
    %22 = vector.broadcast %cst_13 : f32 to vector<16x1xf32>
    %23 = arith.addf %19, %22 : vector<16x1xf32>
    %24 = math.rsqrt %23 : vector<16x1xf32>
    %25 = vector.broadcast %24 : vector<16x1xf32> to vector<16x32xf32>
    %26 = arith.mulf %21, %25 : vector<16x32xf32>
    %27 = vector.broadcast %6 : vector<1x32xf32> to vector<16x32xf32>
    %28 = arith.mulf %26, %27 : vector<16x32xf32>
    %29 = vector.broadcast %8 : vector<1x32xf32> to vector<16x32xf32>
    %30 = arith.addf %28, %29 : vector<16x32xf32>
    %c0_14 = arith.constant 0 : index
    %c0_15 = arith.constant 0 : index
    %c0_16 = arith.constant 0 : index
    %31 = vector.load %arg6[%c0_14, %c0_15, %c0_16] : memref<1x32x32xf32, #tpu.memory_space<vmem>>, vector<1x32x32xf32>
    %32 = vector.shape_cast %31 : vector<1x32x32xf32> to vector<32x32xf32>
    %cst_17 = arith.constant dense<0.000000e+00> : vector<16x32xf32>
    %33 = tpu.matmul %30, %32, %cst_17 {dimension_numbers = #tpu.dot_dimension_numbers<[1], [0], [0], [1], [0, 0, 1, 1], [], []>} : vector<16x32xf32>, vector<32x32xf32>, vector<16x32xf32> -> vector<16x32xf32>
    %c0_18 = arith.constant 0 : index
    %c0_19 = arith.constant 0 : index
    %c0_20 = arith.constant 0 : index
    %34 = vector.load %arg7[%c0_18, %c0_19, %c0_20] : memref<1x1x32xf32, #tpu.memory_space<vmem>>, vector<1x1x32xf32>
    %35 = vector.shape_cast %34 : vector<1x1x32xf32> to vector<1x32xf32>
    %36 = vector.broadcast %35 : vector<1x32xf32> to vector<16x32xf32>
    %37 = arith.addf %33, %36 : vector<16x32xf32>
    %c0_21 = arith.constant 0 : index
    %c0_22 = arith.constant 0 : index
    %c0_23 = arith.constant 0 : index
    %38 = vector.load %arg8[%c0_21, %c0_22, %c0_23] : memref<1x32x64xf32, #tpu.memory_space<vmem>>, vector<1x32x64xf32>
    %39 = vector.shape_cast %38 : vector<1x32x64xf32> to vector<32x64xf32>
    %cst_24 = arith.constant dense<0.000000e+00> : vector<16x64xf32>
    %40 = tpu.matmul %4, %39, %cst_24 {dimension_numbers = #tpu.dot_dimension_numbers<[1], [0], [0], [1], [0, 0, 1, 1], [], []>} : vector<16x32xf32>, vector<32x64xf32>, vector<16x64xf32> -> vector<16x64xf32>
    %c0_25 = arith.constant 0 : index
    %c0_26 = arith.constant 0 : index
    %c0_27 = arith.constant 0 : index
    %41 = vector.load %arg9[%c0_25, %c0_26, %c0_27] : memref<1x1x64xf32, #tpu.memory_space<vmem>>, vector<1x1x64xf32>
    %42 = vector.shape_cast %41 : vector<1x1x64xf32> to vector<1x64xf32>
    %43 = vector.broadcast %42 : vector<1x64xf32> to vector<16x64xf32>
    %44 = arith.addf %40, %43 : vector<16x64xf32>
    %45 = vector.extract_strided_slice %44 {offsets = [0, 0], sizes = [16, 32], strides = [1, 1]} : vector<16x64xf32> to vector<16x32xf32>
    %46 = vector.extract_strided_slice %44 {offsets = [0, 32], sizes = [16, 32], strides = [1, 1]} : vector<16x64xf32> to vector<16x32xf32>
    %47 = vector.shape_cast %37 : vector<16x32xf32> to vector<2x8x32xf32>
    %48 = vector.shape_cast %45 : vector<16x32xf32> to vector<2x8x32xf32>
    %49 = vector.shape_cast %46 : vector<16x32xf32> to vector<2x8x32xf32>
    %50 = vector.extract_strided_slice %47 {offsets = [0, 0, 0], sizes = [2, 8, 16], strides = [1, 1, 1]} : vector<2x8x32xf32> to vector<2x8x16xf32>
    %51 = vector.extract_strided_slice %48 {offsets = [0, 0, 0], sizes = [2, 8, 16], strides = [1, 1, 1]} : vector<2x8x32xf32> to vector<2x8x16xf32>
    "tpu.trace_start"() <{level = 10 : i32, message = "bqd,bkd->bqk"}> : () -> ()
    %cst_28 = arith.constant dense<0.000000e+00> : vector<2x8x8xf32>
    %52 = tpu.matmul %50, %51, %cst_28 {dimension_numbers = #tpu.dot_dimension_numbers<[2], [2], [1], [1], [0, 0, 0, 1, 1, 1], [0], [0]>} : vector<2x8x16xf32>, vector<2x8x16xf32>, vector<2x8x8xf32> -> vector<2x8x8xf32>
    "tpu.trace_stop"() : () -> ()
    %cst_29 = arith.constant dense<0xFF800000> : vector<2x8xf32>
    %53 = vector.multi_reduction <maximumf>, %52, %cst_29 [2] : vector<2x8x8xf32> to vector<2x8xf32>
    %54 = vector.shape_cast %53 : vector<2x8xf32> to vector<2x8x1xf32>
    %55 = vector.broadcast %54 : vector<2x8x1xf32> to vector<2x8x8xf32>
    %56 = arith.subf %52, %55 : vector<2x8x8xf32>
    %57 = math.exp %56 : vector<2x8x8xf32>
    %cst_30 = arith.constant dense<0.000000e+00> : vector<2x8xf32>
    %58 = vector.multi_reduction <add>, %57, %cst_30 [2] : vector<2x8x8xf32> to vector<2x8xf32>
    %59 = vector.shape_cast %58 : vector<2x8xf32> to vector<2x8x1xf32>
    %60 = tpu.reciprocal %59 {approx = true} : vector<2x8x1xf32> -> vector<2x8x1xf32>
    %61 = vector.broadcast %60 : vector<2x8x1xf32> to vector<2x8x8xf32>
    %62 = arith.mulf %57, %61 : vector<2x8x8xf32>
    %63 = vector.extract_strided_slice %49 {offsets = [0, 0, 0], sizes = [2, 8, 16], strides = [1, 1, 1]} : vector<2x8x32xf32> to vector<2x8x16xf32>
    "tpu.trace_start"() <{level = 10 : i32, message = "bqk,bkd->bqd"}> : () -> ()
    %cst_31 = arith.constant dense<0.000000e+00> : vector<2x8x16xf32>
    %64 = tpu.matmul %62, %63, %cst_31 {dimension_numbers = #tpu.dot_dimension_numbers<[2], [1], [1], [2], [0, 0, 0, 1, 1, 2], [0], [0]>} : vector<2x8x8xf32>, vector<2x8x16xf32>, vector<2x8x16xf32> -> vector<2x8x16xf32>
    "tpu.trace_stop"() : () -> ()
    %65 = vector.extract_strided_slice %47 {offsets = [0, 0, 16], sizes = [2, 8, 16], strides = [1, 1, 1]} : vector<2x8x32xf32> to vector<2x8x16xf32>
    %66 = vector.extract_strided_slice %48 {offsets = [0, 0, 16], sizes = [2, 8, 16], strides = [1, 1, 1]} : vector<2x8x32xf32> to vector<2x8x16xf32>
    "tpu.trace_start"() <{level = 10 : i32, message = "bqd,bkd->bqk"}> : () -> ()
    %cst_32 = arith.constant dense<0.000000e+00> : vector<2x8x8xf32>
    %67 = tpu.matmul %65, %66, %cst_32 {dimension_numbers = #tpu.dot_dimension_numbers<[2], [2], [1], [1], [0, 0, 0, 1, 1, 1], [0], [0]>} : vector<2x8x16xf32>, vector<2x8x16xf32>, vector<2x8x8xf32> -> vector<2x8x8xf32>
    "tpu.trace_stop"() : () -> ()
    %cst_33 = arith.constant dense<0xFF800000> : vector<2x8xf32>
    %68 = vector.multi_reduction <maximumf>, %67, %cst_33 [2] : vector<2x8x8xf32> to vector<2x8xf32>
    %69 = vector.shape_cast %68 : vector<2x8xf32> to vector<2x8x1xf32>
    %70 = vector.broadcast %69 : vector<2x8x1xf32> to vector<2x8x8xf32>
    %71 = arith.subf %67, %70 : vector<2x8x8xf32>
    %72 = math.exp %71 : vector<2x8x8xf32>
    %cst_34 = arith.constant dense<0.000000e+00> : vector<2x8xf32>
    %73 = vector.multi_reduction <add>, %72, %cst_34 [2] : vector<2x8x8xf32> to vector<2x8xf32>
    %74 = vector.shape_cast %73 : vector<2x8xf32> to vector<2x8x1xf32>
    %75 = tpu.reciprocal %74 {approx = true} : vector<2x8x1xf32> -> vector<2x8x1xf32>
    %76 = vector.broadcast %75 : vector<2x8x1xf32> to vector<2x8x8xf32>
    %77 = arith.mulf %72, %76 : vector<2x8x8xf32>
    %78 = vector.extract_strided_slice %49 {offsets = [0, 0, 16], sizes = [2, 8, 16], strides = [1, 1, 1]} : vector<2x8x32xf32> to vector<2x8x16xf32>
    "tpu.trace_start"() <{level = 10 : i32, message = "bqk,bkd->bqd"}> : () -> ()
    %cst_35 = arith.constant dense<0.000000e+00> : vector<2x8x16xf32>
    %79 = tpu.matmul %77, %78, %cst_35 {dimension_numbers = #tpu.dot_dimension_numbers<[2], [1], [1], [2], [0, 0, 0, 1, 1, 2], [0], [0]>} : vector<2x8x8xf32>, vector<2x8x16xf32>, vector<2x8x16xf32> -> vector<2x8x16xf32>
    "tpu.trace_stop"() : () -> ()
    %80 = tpu.concatenate %64, %79 in 2 : vector<2x8x16xf32>, vector<2x8x16xf32> -> vector<2x8x32xf32>
    %81 = vector.shape_cast %80 : vector<2x8x32xf32> to vector<16x32xf32>
    %c0_36 = arith.constant 0 : index
    %c0_37 = arith.constant 0 : index
    %c0_38 = arith.constant 0 : index
    %82 = vector.load %arg10[%c0_36, %c0_37, %c0_38] : memref<1x32x32xf32, #tpu.memory_space<vmem>>, vector<1x32x32xf32>
    %83 = vector.shape_cast %82 : vector<1x32x32xf32> to vector<32x32xf32>
    %cst_39 = arith.constant dense<0.000000e+00> : vector<16x32xf32>
    %84 = tpu.matmul %81, %83, %cst_39 {dimension_numbers = #tpu.dot_dimension_numbers<[1], [0], [0], [1], [0, 0, 1, 1], [], []>} : vector<16x32xf32>, vector<32x32xf32>, vector<16x32xf32> -> vector<16x32xf32>
    %c0_40 = arith.constant 0 : index
    %c0_41 = arith.constant 0 : index
    %c0_42 = arith.constant 0 : index
    %85 = vector.load %arg11[%c0_40, %c0_41, %c0_42] : memref<1x1x32xf32, #tpu.memory_space<vmem>>, vector<1x1x32xf32>
    %86 = vector.shape_cast %85 : vector<1x1x32xf32> to vector<1x32xf32>
    %87 = vector.broadcast %86 : vector<1x32xf32> to vector<16x32xf32>
    %88 = arith.addf %84, %87 : vector<16x32xf32>
    %89 = arith.addf %30, %88 : vector<16x32xf32>
    %c0_43 = arith.constant 0 : index
    %c0_44 = arith.constant 0 : index
    %c0_45 = arith.constant 0 : index
    %90 = vector.load %arg12[%c0_43, %c0_44, %c0_45] : memref<1x1x32xf32, #tpu.memory_space<vmem>>, vector<1x1x32xf32>
    %91 = vector.shape_cast %90 : vector<1x1x32xf32> to vector<1x32xf32>
    %c0_46 = arith.constant 0 : index
    %c0_47 = arith.constant 0 : index
    %c0_48 = arith.constant 0 : index
    %92 = vector.load %arg13[%c0_46, %c0_47, %c0_48] : memref<1x1x32xf32, #tpu.memory_space<vmem>>, vector<1x1x32xf32>
    %93 = vector.shape_cast %92 : vector<1x1x32xf32> to vector<1x32xf32>
    %cst_49 = arith.constant dense<0.000000e+00> : vector<16xf32>
    %94 = vector.multi_reduction <add>, %89, %cst_49 [1] : vector<16x32xf32> to vector<16xf32>
    %95 = vector.shape_cast %94 : vector<16xf32> to vector<16x1xf32>
    %cst_50 = arith.constant 3.200000e+01 : f32
    %96 = vector.broadcast %cst_50 : f32 to vector<16x1xf32>
    %97 = arith.divf %95, %96 : vector<16x1xf32>
    %98 = vector.broadcast %97 : vector<16x1xf32> to vector<16x32xf32>
    %99 = arith.subf %89, %98 : vector<16x32xf32>
    %100 = arith.mulf %99, %99 : vector<16x32xf32>
    %cst_51 = arith.constant dense<0.000000e+00> : vector<16xf32>
    %101 = vector.multi_reduction <add>, %100, %cst_51 [1] : vector<16x32xf32> to vector<16xf32>
    %102 = vector.shape_cast %101 : vector<16xf32> to vector<16x1xf32>
    %cst_52 = arith.constant 3.200000e+01 : f32
    %103 = vector.broadcast %cst_52 : f32 to vector<16x1xf32>
    %104 = arith.divf %102, %103 : vector<16x1xf32>
    %105 = vector.broadcast %97 : vector<16x1xf32> to vector<16x32xf32>
    %106 = arith.subf %89, %105 : vector<16x32xf32>
    %cst_53 = arith.constant 9.99999993E-9 : f32
    %107 = vector.broadcast %cst_53 : f32 to vector<16x1xf32>
    %108 = arith.addf %104, %107 : vector<16x1xf32>
    %109 = math.rsqrt %108 : vector<16x1xf32>
    %110 = vector.broadcast %109 : vector<16x1xf32> to vector<16x32xf32>
    %111 = arith.mulf %106, %110 : vector<16x32xf32>
    %112 = vector.broadcast %91 : vector<1x32xf32> to vector<16x32xf32>
    %113 = arith.mulf %111, %112 : vector<16x32xf32>
    %114 = vector.broadcast %93 : vector<1x32xf32> to vector<16x32xf32>
    %115 = arith.addf %113, %114 : vector<16x32xf32>
    %c0_54 = arith.constant 0 : index
    %c0_55 = arith.constant 0 : index
    %c0_56 = arith.constant 0 : index
    %116 = vector.load %arg14[%c0_54, %c0_55, %c0_56] : memref<1x32x32xf32, #tpu.memory_space<vmem>>, vector<1x32x32xf32>
    %117 = vector.shape_cast %116 : vector<1x32x32xf32> to vector<32x32xf32>
    %cst_57 = arith.constant dense<0.000000e+00> : vector<16x32xf32>
    %118 = tpu.matmul %115, %117, %cst_57 {dimension_numbers = #tpu.dot_dimension_numbers<[1], [0], [0], [1], [0, 0, 1, 1], [], []>} : vector<16x32xf32>, vector<32x32xf32>, vector<16x32xf32> -> vector<16x32xf32>
    %c0_58 = arith.constant 0 : index
    %c0_59 = arith.constant 0 : index
    %c0_60 = arith.constant 0 : index
    %119 = vector.load %arg15[%c0_58, %c0_59, %c0_60] : memref<1x1x32xf32, #tpu.memory_space<vmem>>, vector<1x1x32xf32>
    %120 = vector.shape_cast %119 : vector<1x1x32xf32> to vector<1x32xf32>
    %121 = vector.broadcast %120 : vector<1x32xf32> to vector<16x32xf32>
    %122 = arith.addf %118, %121 : vector<16x32xf32>
    %cst_61 = arith.constant 0.000000e+00 : f32
    %123 = vector.broadcast %cst_61 : f32 to vector<16x32xf32>
    %124 = arith.maximumf %122, %123 : vector<16x32xf32>
    %c0_62 = arith.constant 0 : index
    %c0_63 = arith.constant 0 : index
    %c0_64 = arith.constant 0 : index
    %125 = vector.load %arg16[%c0_62, %c0_63, %c0_64] : memref<1x32x32xf32, #tpu.memory_space<vmem>>, vector<1x32x32xf32>
    %126 = vector.shape_cast %125 : vector<1x32x32xf32> to vector<32x32xf32>
    %cst_65 = arith.constant dense<0.000000e+00> : vector<16x32xf32>
    %127 = tpu.matmul %124, %126, %cst_65 {dimension_numbers = #tpu.dot_dimension_numbers<[1], [0], [0], [1], [0, 0, 1, 1], [], []>} : vector<16x32xf32>, vector<32x32xf32>, vector<16x32xf32> -> vector<16x32xf32>
    %c0_66 = arith.constant 0 : index
    %c0_67 = arith.constant 0 : index
    %c0_68 = arith.constant 0 : index
    %128 = vector.load %arg17[%c0_66, %c0_67, %c0_68] : memref<1x1x32xf32, #tpu.memory_space<vmem>>, vector<1x1x32xf32>
    %129 = vector.shape_cast %128 : vector<1x1x32xf32> to vector<1x32xf32>
    %130 = vector.broadcast %129 : vector<1x32xf32> to vector<16x32xf32>
    %131 = arith.addf %127, %130 : vector<16x32xf32>
    %132 = arith.addf %131, %115 : vector<16x32xf32>
    %133 = vector.broadcast %0 : vector<16x1xf32> to vector<16x32xf32>
    %134 = arith.mulf %132, %133 : vector<16x32xf32>
    %c0_69 = arith.constant 0 : index
    %c0_70 = arith.constant 0 : index
    %135 = vector.load %arg21[%c0_69, %c0_70] : memref<16x32xf32, #tpu.memory_space<vmem>>, vector<16x32xf32>
    tpu.vector_store %arg21[%c0_69, %c0_70], %134 {strides = array<i32>} : memref<16x32xf32, #tpu.memory_space<vmem>>, vector<16x32xf32>,
    %c1_i32 = arith.constant 1 : i32
    %136 = arith.cmpi eq, %arg1, %c1_i32 : i32
    %137 = arith.extui %136 : i1 to i32
    %c0_i32_71 = arith.constant 0 : i32
    %138 = arith.cmpi ne, %137, %c0_i32_71 : i32
    scf.if %138 {
      %c0_72 = arith.constant 0 : index
      %c0_73 = arith.constant 0 : index
      %139 = vector.load %arg18[%c0_72, %c0_73] : memref<1x32xf32, #tpu.memory_space<vmem>>, vector<1x32xf32>
      %c0_74 = arith.constant 0 : index
      %c0_75 = arith.constant 0 : index
      %140 = vector.load %arg19[%c0_74, %c0_75] : memref<1x32xf32, #tpu.memory_space<vmem>>, vector<1x32xf32>
      %cst_76 = arith.constant dense<0.000000e+00> : vector<16xf32>
      %141 = vector.multi_reduction <add>, %134, %cst_76 [1] : vector<16x32xf32> to vector<16xf32>
      %142 = vector.shape_cast %141 : vector<16xf32> to vector<16x1xf32>
      %cst_77 = arith.constant 3.200000e+01 : f32
      %143 = vector.broadcast %cst_77 : f32 to vector<16x1xf32>
      %144 = arith.divf %142, %143 : vector<16x1xf32>
      %145 = vector.broadcast %144 : vector<16x1xf32> to vector<16x32xf32>
      %146 = arith.subf %134, %145 : vector<16x32xf32>
      %147 = arith.mulf %146, %146 : vector<16x32xf32>
      %cst_78 = arith.constant dense<0.000000e+00> : vector<16xf32>
      %148 = vector.multi_reduction <add>, %147, %cst_78 [1] : vector<16x32xf32> to vector<16xf32>
      %149 = vector.shape_cast %148 : vector<16xf32> to vector<16x1xf32>
      %cst_79 = arith.constant 3.200000e+01 : f32
      %150 = vector.broadcast %cst_79 : f32 to vector<16x1xf32>
      %151 = arith.divf %149, %150 : vector<16x1xf32>
      %152 = vector.broadcast %144 : vector<16x1xf32> to vector<16x32xf32>
      %153 = arith.subf %134, %152 : vector<16x32xf32>
      %cst_80 = arith.constant 9.99999993E-9 : f32
      %154 = vector.broadcast %cst_80 : f32 to vector<16x1xf32>
      %155 = arith.addf %151, %154 : vector<16x1xf32>
      %156 = math.rsqrt %155 : vector<16x1xf32>
      %157 = vector.broadcast %156 : vector<16x1xf32> to vector<16x32xf32>
      %158 = arith.mulf %153, %157 : vector<16x32xf32>
      %159 = vector.broadcast %139 : vector<1x32xf32> to vector<16x32xf32>
      %160 = arith.mulf %158, %159 : vector<16x32xf32>
      %161 = vector.broadcast %140 : vector<1x32xf32> to vector<16x32xf32>
      %162 = arith.addf %160, %161 : vector<16x32xf32>
      %c0_81 = arith.constant 0 : index
      %c0_82 = arith.constant 0 : index
      %163 = vector.load %arg20[%c0_81, %c0_82] : memref<16x32xf32, #tpu.memory_space<vmem>>, vector<16x32xf32>
      tpu.vector_store %arg20[%c0_81, %c0_82], %162 {strides = array<i32>} : memref<16x32xf32, #tpu.memory_space<vmem>>, vector<16x32xf32>,
    } else {
    }
    return
  }
  func.func @transform_0(%arg0: i32, %arg1: i32) -> (i32, i32) {
    %c0_i32 = arith.constant 0 : i32
    %c0_i32_0 = arith.constant 0 : i32
    return %arg0, %c0_i32 : i32, i32
  }
  func.func @transform_1(%arg0: i32, %arg1: i32) -> (i32, i32) {
    %c0_i32 = arith.constant 0 : i32
    %c0_i32_0 = arith.constant 0 : i32
    return %arg0, %c0_i32 : i32, i32
  }
  func.func @transform_2(%arg0: i32, %arg1: i32) -> (i32, i32, i32) {
    %c0_i32 = arith.constant 0 : i32
    %c0_i32_0 = arith.constant 0 : i32
    %c0_i32_1 = arith.constant 0 : i32
    return %arg1, %c0_i32, %c0_i32_0 : i32, i32, i32
  }
  func.func @transform_3(%arg0: i32, %arg1: i32) -> (i32, i32, i32) {
    %c0_i32 = arith.constant 0 : i32
    %c0_i32_0 = arith.constant 0 : i32
    %c0_i32_1 = arith.constant 0 : i32
    return %arg1, %c0_i32, %c0_i32_0 : i32, i32, i32
  }
  func.func @transform_4(%arg0: i32, %arg1: i32) -> (i32, i32, i32) {
    %c0_i32 = arith.constant 0 : i32
    %c0_i32_0 = arith.constant 0 : i32
    %c0_i32_1 = arith.constant 0 : i32
    return %arg1, %c0_i32, %c0_i32_0 : i32, i32, i32
  }
  func.func @transform_5(%arg0: i32, %arg1: i32) -> (i32, i32, i32) {
    %c0_i32 = arith.constant 0 : i32
    %c0_i32_0 = arith.constant 0 : i32
    %c0_i32_1 = arith.constant 0 : i32
    return %arg1, %c0_i32, %c0_i32_0 : i32, i32, i32
  }
  func.func @transform_6(%arg0: i32, %arg1: i32) -> (i32, i32, i32) {
    %c0_i32 = arith.constant 0 : i32
    %c0_i32_0 = arith.constant 0 : i32
    %c0_i32_1 = arith.constant 0 : i32
    return %arg1, %c0_i32, %c0_i32_0 : i32, i32, i32
  }
  func.func @transform_7(%arg0: i32, %arg1: i32) -> (i32, i32, i32) {
    %c0_i32 = arith.constant 0 : i32
    %c0_i32_0 = arith.constant 0 : i32
    %c0_i32_1 = arith.constant 0 : i32
    return %arg1, %c0_i32, %c0_i32_0 : i32, i32, i32
  }
  func.func @transform_8(%arg0: i32, %arg1: i32) -> (i32, i32, i32) {
    %c0_i32 = arith.constant 0 : i32
    %c0_i32_0 = arith.constant 0 : i32
    %c0_i32_1 = arith.constant 0 : i32
    return %arg1, %c0_i32, %c0_i32_0 : i32, i32, i32
  }
  func.func @transform_9(%arg0: i32, %arg1: i32) -> (i32, i32, i32) {
    %c0_i32 = arith.constant 0 : i32
    %c0_i32_0 = arith.constant 0 : i32
    %c0_i32_1 = arith.constant 0 : i32
    return %arg1, %c0_i32, %c0_i32_0 : i32, i32, i32
  }
  func.func @transform_10(%arg0: i32, %arg1: i32) -> (i32, i32, i32) {
    %c0_i32 = arith.constant 0 : i32
    %c0_i32_0 = arith.constant 0 : i32
    %c0_i32_1 = arith.constant 0 : i32
    return %arg1, %c0_i32, %c0_i32_0 : i32, i32, i32
  }
  func.func @transform_11(%arg0: i32, %arg1: i32) -> (i32, i32, i32) {
    %c0_i32 = arith.constant 0 : i32
    %c0_i32_0 = arith.constant 0 : i32
    %c0_i32_1 = arith.constant 0 : i32
    return %arg1, %c0_i32, %c0_i32_0 : i32, i32, i32
  }
  func.func @transform_12(%arg0: i32, %arg1: i32) -> (i32, i32, i32) {
    %c0_i32 = arith.constant 0 : i32
    %c0_i32_0 = arith.constant 0 : i32
    %c0_i32_1 = arith.constant 0 : i32
    return %arg1, %c0_i32, %c0_i32_0 : i32, i32, i32
  }
  func.func @transform_13(%arg0: i32, %arg1: i32) -> (i32, i32, i32) {
    %c0_i32 = arith.constant 0 : i32
    %c0_i32_0 = arith.constant 0 : i32
    %c0_i32_1 = arith.constant 0 : i32
    return %arg1, %c0_i32, %c0_i32_0 : i32, i32, i32
  }
  func.func @transform_14(%arg0: i32, %arg1: i32) -> (i32, i32, i32) {
    %c0_i32 = arith.constant 0 : i32
    %c0_i32_0 = arith.constant 0 : i32
    %c0_i32_1 = arith.constant 0 : i32
    return %arg1, %c0_i32, %c0_i32_0 : i32, i32, i32
  }
  func.func @transform_15(%arg0: i32, %arg1: i32) -> (i32, i32, i32) {
    %c0_i32 = arith.constant 0 : i32
    %c0_i32_0 = arith.constant 0 : i32
    %c0_i32_1 = arith.constant 0 : i32
    return %arg1, %c0_i32, %c0_i32_0 : i32, i32, i32
  }
  func.func @transform_16(%arg0: i32, %arg1: i32) -> (i32, i32) {
    %c0_i32 = arith.constant 0 : i32
    %c0_i32_0 = arith.constant 0 : i32
    %c0_i32_1 = arith.constant 0 : i32
    return %c0_i32, %c0_i32_0 : i32, i32
  }
  func.func @transform_17(%arg0: i32, %arg1: i32) -> (i32, i32) {
    %c0_i32 = arith.constant 0 : i32
    %c0_i32_0 = arith.constant 0 : i32
    %c0_i32_1 = arith.constant 0 : i32
    return %c0_i32, %c0_i32_0 : i32, i32
  }
  func.func @transform_18(%arg0: i32, %arg1: i32) -> (i32, i32) {
    %c0_i32 = arith.constant 0 : i32
    %c0_i32_0 = arith.constant 0 : i32
    return %arg0, %c0_i32 : i32, i32
  }
}

</mosaic_0001>

<bundles_post_ra>
// kernel: tpu_custom_call.1
= control target key start
LH: loop header
LB: loop body
LE: loop exit
PB: predicated region body
PF: predicated region fallthrough
CT: control target
= control target key end

     0   :  { %s2990_s0 = inlined_call_operand.vmem [shape: f32[16,32], index: 0, kind: input, shape index: {}]   ;;  %s2991_s1 = inlined_call_operand.vmem [shape: f32[16,1], index: 1, kind: input, shape index: {}]   ;;  %s2992_s2 = inlined_call_operand.vmem [shape: f32[2,1,32], index: 2, kind: input, shape index: {}]   ;;  %s2993_s3 = inlined_call_operand.hbm [shape: f32[2,1,32], index: 3, kind: input, shape index: {}]   ;;  %s2994_s4 = inlined_call_operand.hbm [shape: f32[2,32,32], index: 4, kind: input, shape index: {}]   ;;  %s2995_s5 = inlined_call_operand.vmem [shape: f32[2,1,32], index: 5, kind: input, shape index: {}]   ;;  %s2996_s6 = inlined_call_operand.hbm [shape: f32[2,32,64], index: 6, kind: input, shape index: {}]   ;;  %s2997_s7 = inlined_call_operand.vmem [shape: f32[2,1,64], index: 7, kind: input, shape index: {}]   ;;  %s2998_s8 = inlined_call_operand.hbm [shape: f32[2,32,32], index: 8, kind: input, shape index: {}]   ;;  %s2999_s9 = inlined_call_operand.vmem [shape: f32[2,1,32], index: 9, kind: input, shape index: {}]   ;;  %s3000_s10 = inlined_call_operand.vmem [shape: f32[2,1,32], index: 10, kind: input, shape index: {}]   ;;  %s3001_s11 = inlined_call_operand.hbm [shape: f32[2,1,32], index: 11, kind: input, shape index: {}]   ;;  %s3002_s12 = inlined_call_operand.hbm [shape: f32[2,32,32], index: 12, kind: input, shape index: {}]   ;;  %s3003_s13 = inlined_call_operand.vmem [shape: f32[2,1,32], index: 13, kind: input, shape index: {}]   ;;  %s3004_s14 = inlined_call_operand.hbm [shape: f32[2,32,32], index: 14, kind: input, shape index: {}]   ;;  %s3005_s15 = inlined_call_operand.vmem [shape: f32[2,1,32], index: 15, kind: input, shape index: {}]   ;;  %s3006_s16 = inlined_call_operand.vmem [shape: f32[1,32], index: 16, kind: input, shape index: {}]   ;;  %s3007_s17 = inlined_call_operand.vmem [shape: f32[1,32], index: 17, kind: input, shape index: {}]   ;;  %s3008_s18 = inlined_call_operand.hbm [shape: f32[16,32], index: 18, kind: output, shape index: {}]  }
   0x1   :  { %3019 = sst [smem:[#allocation27_spill]] %s2990_s0 }
   0x2   :  { %3020 = sst [smem:[#allocation28_spill]] %s2991_s1 }
   0x3   :  { %3021 = sst [smem:[#allocation29_spill]] %s2992_s2 }
   0x4   :  { %3022 = sst [smem:[#allocation30_spill]] %s2993_s3 }
   0x5   :  { %3023 = sst [smem:[#allocation31_spill]] %s2994_s4 }
   0x6   :  { %3024 = sst [smem:[#allocation32_spill]] %s2995_s5 }
   0x7   :  { %3025 = sst [smem:[#allocation33_spill]] %s2996_s6 }
   0x8   :  { %3026 = sst [smem:[#allocation34_spill]] %s2997_s7 }
   0x9   :  { %3027 = sst [smem:[#allocation35_spill]] %s2998_s8 }
   0xa   :  { %3028 = sst [smem:[#allocation36_spill]] %s2999_s9 }
   0xb   :  { %3029 = sst [smem:[#allocation37_spill]] %s3000_s10 }
   0xc   :  { %3030 = sst [smem:[#allocation38_spill]] %s3001_s11 }
   0xd   :  { %3031 = sst [smem:[#allocation39_spill]] %s3002_s12 }
   0xe   :  { %3032 = sst [smem:[#allocation40_spill]] %s3003_s13 }
   0xf   :  { %3033 = sst [smem:[#allocation41_spill]] %s3004_s14 }
  0x10   :  { %3034 = sst [smem:[#allocation42_spill]] %s3005_s15 }
  0x11   :  { %3035 = sst [smem:[#allocation43_spill]] %s3006_s16 }
  0x12   :  { %3036 = sst [smem:[#allocation44_spill]] %s3007_s17 }
  0x13   :  { %3037 = sst [smem:[#allocation45_spill]] %s3008_s18 }
  0x14   :  { %23 = vsyncpa [#allocation4], 0 }
  0x15   :  { %25 = vsyncpa [#allocation4 + $0x1], 0 }
  0x16   :  { %26 = vsyncpa [#allocation7], 0 }
  0x17   :  { %28 = vsyncpa [#allocation7 + $0x1], 0 }
  0x18   :  { %29 = vsyncpa [#allocation10], 0 }
  0x19   :  { %31 = vsyncpa [#allocation10 + $0x1], 0 }
  0x1a   :  { %32 = vsyncpa [#allocation13], 0 }
  0x1b   :  { %34 = vsyncpa [#allocation13 + $0x1], 0 }
  0x1c   :  { %35 = vsyncpa [#allocation5], 0  ;;  %s2565_s27 = smov 0   ;;  %s2567_s28 = smov 0  }
  0x1d   :  { %s2569_s29 = smov 0   ;;  %s2571_s30 = smov 0  }
  0x1e   :  { %s2573_s0 = smov 0   ;;  %s2575_s19 = smov 0  }
  0x1f LB: > { %3038 = sst [smem:[#allocation21_spill]] %s2440_s28  ;;  %s2594_s1 = sadd.s32 4294967295, %s2456_s19   ;;  %s2456_s19 = sphi %s2575_s19, %s41_s19   ;;  %s2452_s0 = sphi %s2573_s0, %s3085_s0   ;;  %s2448_s30 = sphi %s2571_s30, %s3084_s30   ;;  %s2444_s29 = sphi %s2569_s29, %s3083_s29   ;;  %s2440_s28 = sphi %s2567_s28, %s3082_s28   ;;  %s2436_s27 = sphi %s2565_s27, %s3081_s27  }
  0x20   : > { %3039 = sst [smem:[#allocation22_spill]] %s2444_s29  ;;  %s50_s20 = sadd.s32 1, %s2452_s0 }
  0x21   : > { %3040 = sst [smem:[#allocation23_spill]] %s2452_s0  ;;  %p51_p0 = scmp.ge.s32.totalorder %s50_s20, 2 }
  0x22   : > { %3041 = sst [smem:[#allocation24_spill]] %s2456_s19  ;;  %s138_s21 = sadd.s32 1, %s2444_s29 }
  0x23   : > { %p145_p1 = scmp.ne.s32.totalorder %s2444_s29, %s2440_s28  ;;  %p146_p2 = scmp.eq.s32.totalorder %s2456_s19, 0 }
  0x24   : > { %s3087_s20 = smov (%p51_p0, %s50_s20), 0  ;;  %p151_p4 = scmp.ne.s32.totalorder %s2440_s28, %s2436_s27 }
  0x25   : > { %3042 = sst [smem:[#allocation25_spill]] %s3087_s20  ;;  %p147_p3 = por %p146_p2, %p145_p1 }
  0x26   : > { %s135_s22 = ssub.s32 %s2452_s0, %s3087_s20  ;;  %p152_p5 = scmp.eq.s32.totalorder %s2594_s1, 0 }
  0x27   : > { %p136_p6 = scmp.eq.s32.totalorder %s135_s22, 0  ;;  %p2045_p8 = scmp.lt.s32.totalorder %s2456_s19, 2 }
  0x28   : > { %p2607_p7 = por %p152_p5, %p151_p4  ;;  %s2616_s24 = sand.u32 1, %s2444_s29  }
  0x29   : > { %s2613_s23 = scalar_select %p136_p6, %s2444_s29, %s138_s21  }
  0x2a   : > { %p2618_p9 = pnand %p2045_p8, %p147_p3  ;;  %s2623_s26 = sand.u32 1, %s2456_s19  }
  0x2b   : > { %3044 = sst [smem:[#allocation26_spill]] %s2613_s23  ;;  %s2626_s27 = sshll.u32 %s2616_s24, 5 }
  0x2c   : > { %s2629_s22 = sshll.u32 %s2452_s0, 5  ;;  %s3046_s4 = sld [smem:[#allocation31_spill]] }
  0x2d   : > { %s606_s29 = scalar_lea.vmem [#allocation6], %s2626_s27  ;;  %p1962_p10 = scmp.ge.s32.totalorder %s2456_s19, 1 }
  0x2e   : > { %s614_s18 = sshll.u32 %s606_s29, 4  ;;  %s3013_s16 = scalar_lea.sflag [#allocation7], %s2623_s26  ;;  %s615_s18 = int_to_ptr.vmem [resolvable:$true] %s614_s18 }
  0x2f   : > { %s2458_s15 = smov 128   ;;  %s2459_s13 = smov 8  }
  0x30   : > { %p763_p11 = scmp.lt.s32.totalorder %s2456_s19, 3  ;;  %s3047_s8 = sld [smem:[#allocation35_spill]] }
  0x31   : > { %s662_s10 = scalar_lea.vmem [#allocation9], %s2626_s27  ;;  %s3049_s12 = sld [smem:[#allocation39_spill]] }
  0x32   : > { %s611_s23 = scalar_lea.hbm %s3046_s4, %s2629_s22  ;;  %p2650_p12 = pnand %p1962_p10, %p763_p11 }
  0x33   : > { %s612_s17 = sshll.u32 %s611_s23, 4  ;;  %s670_s9 = sshll.u32 %s662_s10, 4  ;;  %s613_s17 = int_to_ptr.hbm [resolvable:$true] %s612_s17  ;;  %s671_s9 = int_to_ptr.vmem [resolvable:$true] %s670_s9 }
  0x34   : > { %2029 = dma.hbm_to_vmem [thread:$0]  (!%p2618_p9), %s613_s17, 512, %s615_s18, %s3013_s16, %s2458_s15, %s2458_s15, %s2459_s13  }
  0x35   : > { %s3014_s17 = scalar_lea.sflag [#allocation10], %s2623_s26  ;;  %s713_s16 = scalar_lea.vmem [#allocation12], %s2626_s27 }
  0x36   : > { %s667_s23 = scalar_lea.hbm %s3047_s8, %s2629_s22  ;;  %s721_s8 = sshll.u32 %s713_s16, 4  ;;  %s722_s8 = int_to_ptr.vmem [resolvable:$true] %s721_s8 }
  0x37   : > { %s668_s4 = sshll.u32 %s667_s23, 4  ;;  %s718_s20 = scalar_lea.hbm %s3049_s12, %s2629_s22  ;;  %s669_s4 = int_to_ptr.hbm [resolvable:$true] %s668_s4 }
  0x38   : > { %2035 = dma.hbm_to_vmem [thread:$0]  (!%p2618_p9), %s669_s4, 512, %s671_s9, %s3014_s17, %s2458_s15, %s2458_s15, %s2459_s13  }
  0x39   : > { %s719_s23 = sshll.u32 %s718_s20, 4  ;;  %s3016_s10 = scalar_lea.sflag [#allocation13], %s2623_s26  ;;  %s720_s23 = int_to_ptr.hbm [resolvable:$true] %s719_s23 }
  0x3a   : > { %2041 = dma.hbm_to_vmem [thread:$0]  (!%p2618_p9), %s720_s23, 512, %s722_s8, %s3016_s10, %s2458_s15, %s2458_s15, %s2459_s13  }
  0x3b   : > { %s3050_s3 = sld [smem:[#allocation30_spill]]  ;;  %s588_s29 = scalar_lea.vmem [#allocation3], %s2616_s24 }
  0x3c   : > { %s595_s20 = sshll.u32 %s588_s29, 4  ;;  %s586_s17 = scalar_lea.sflag [#allocation4], %s2616_s24  ;;  %s596_s20 = int_to_ptr.vmem [resolvable:$true] %s595_s20 }
  0x3d   : > { %s3051_s6 = sld [smem:[#allocation33_spill]]  ;;  %s634_s23 = scalar_lea.vmem [#allocation8], %s2626_s27 }
  0x3e   : > { %s642_s4 = sshll.u32 %s634_s23, 4  ;;  %s3053_s11 = sld [smem:[#allocation38_spill]]  ;;  %s643_s4 = int_to_ptr.vmem [resolvable:$true] %s642_s4 }
  0x3f   : > { %s695_s12 = scalar_lea.vmem [#allocation11], %s2616_s24  ;;  %s3055_s14 = sld [smem:[#allocation41_spill]] }
  0x40   : > { %s702_s19 = sshll.u32 %s695_s12, 4  ;;  %s3056_s24 = scalar_lea.sflag [#allocation13], %s2623_s26  ;;  %s703_s19 = int_to_ptr.vmem [resolvable:$true] %s702_s19 }
  0x41   : > { %s591_s18 = scalar_lea.hbm %s3050_s3, %s2452_s0 }
  0x42   : > { %s593_s16 = sshll.u32 %s591_s18, 4  ;;  %s3052_s18 = scalar_lea.sflag [#allocation7], %s2623_s26  ;;  %s594_s16 = int_to_ptr.hbm [resolvable:$true] %s593_s16 }
  0x43   : > { %2026 = dma.hbm_to_vmem [thread:$0]  (!%p2618_p9), %s594_s16, 16, %s596_s20, %s586_s17  }
  0x44   : > { %s639_s8 = scalar_lea.hbm %s3051_s6, %s2629_s22  ;;  %s698_s20 = scalar_lea.hbm %s3053_s11, %s2452_s0 }
  0x45   : > { %s640_s9 = sshll.u32 %s639_s8, 4  ;;  %s700_s16 = sshll.u32 %s698_s20, 4  ;;  %s641_s9 = int_to_ptr.hbm [resolvable:$true] %s640_s9  ;;  %s701_s16 = int_to_ptr.hbm [resolvable:$true] %s700_s16 }
  0x46   : > { %2032 = dma.hbm_to_vmem [thread:$0]  (!%p2618_p9), %s641_s9, 512, %s643_s4, %s3052_s18, %s2458_s15, %s2458_s15, %s2459_s13  }
  0x47   : > { %s3054_s8 = scalar_lea.sflag [#allocation10], %s2623_s26  ;;  %s746_s3 = scalar_lea.hbm %s3055_s14, %s2629_s22 }
  0x48   : > { %2038 = dma.hbm_to_vmem [thread:$0]  (!%p2618_p9), %s701_s16, 16, %s703_s19, %s3054_s8  }
  0x49   : > { %s741_s6 = scalar_lea.vmem [#allocation14], %s2626_s27  ;;  %s747_s5 = sshll.u32 %s746_s3, 4  ;;  %s748_s5 = int_to_ptr.hbm [resolvable:$true] %s747_s5 }
  0x4a   : > { %s749_s7 = sshll.u32 %s741_s6, 4  ;;  %767 = sbr.rel (%p2650_p12) target bundleno = 2650 (0xa5a), region = 92  ;;  %s750_s7 = int_to_ptr.vmem [resolvable:$true] %s749_s7 }
  0x4b   : > { %2044 = dma.hbm_to_vmem [thread:$0]  (!%p2618_p9), %s748_s5, 512, %s750_s7, %s3056_s24, %s2458_s15, %s2458_s15, %s2459_s13  }
  0x4c   : > { %s2720_s4 = sand.u32 (!%p2650_p12), 1, %s2440_s28  }
  0x4d   : > { %s770_s27 = scalar_lea.sflag (!%p2650_p12), [#allocation4], %s2720_s4 }
  0x4f   : > { %2415 = dma.done.wait (%p2607_p7), %s770_s27, 16  }
  0x50   : > { %2417 = vsyncadd (%p2607_p7), %s770_s27, 4294967280  ;;  %s778_s3 = sand.u32 1, %s2594_s1   ;;  %s1963_s5 = sshll.u32 %s2720_s4, 5 }
  0x51   : > { %s779_s7 = scalar_lea.sflag [#allocation7], %s778_s3  ;;  %s2730_s13 = scalar_lea.vmem [#allocation6], %s1963_s5 }
  0x52   : > { %2419 = dma.done.wait (%p2607_p7), %s779_s7, 1024  }
  0x53   : > { %2421 = vsyncadd (%p2607_p7), %s779_s7, 4294966272  ;;  %s2736_s15 = scalar_lea.vmem [#allocation8], %s1963_s5  ;;  %s799_s25 = scalar_lea.sflag [#allocation10], %s778_s3 }
  0x54   : > { %s2738_s26 = scalar_lea.vmem [#allocation9], %s1963_s5 }
  0x55   : > { %2423 = dma.done.wait (%p2607_p7), %s799_s25, 528  }
  0x56   : > { %2425 = vsyncadd (%p2607_p7), %s799_s25, 4294966768  ;;  %s818_s21 = scalar_lea.sflag [#allocation13], %s778_s3  ;;  %s2745_s10 = scalar_lea.vmem [#allocation12], %s1963_s5 }
  0x57   : > { %2427 = dma.done.wait (%p2607_p7), %s818_s21, 1024  }
  0x58   : > { %2429 = vsyncadd (%p2607_p7), %s818_s21, 4294966272  ;;  %p951_p13 = scmp.lt.s32.totalorder %s2448_s30, 1  ;;  %s3058_s2 = sld [smem:[#allocation32_spill]] }
  0x59   : > { %s3059_s24 = sld [smem:[#allocation34_spill]]  ;;  %s2793_s7 = scalar_lea.vmem [#allocation14], %s1963_s5 }
  0x5a   : > { %s2753_s9 = scalar_select %p951_p13, %s2448_s30, 1 }
  0x5b   : > { %s3060_s25 = sld [smem:[#allocation36_spill]]  ;;  %p1968_p0 = scmp.ne.s32.totalorder %s2448_s30, 0 }
  0x5c   : > { %s3061_s22 = sld [smem:[#allocation37_spill]] }
  0x5d   : > { %s3062_s0 = sld [smem:[#allocation40_spill]] }
  0x5e   : > { %s956_s16 = scalar_lea.vmem %s3058_s2, %s2753_s9  ;;  %s3063_s12 = sld [smem:[#allocation28_spill]] }
  0x5f   : > { %s959_s27 = scalar_lea.vmem %s3059_s24, %s2753_s9  ;;  %s3064_s24 = sld [smem:[#allocation42_spill]] }
  0x60   : > { %s3065_s28 = sld [smem:[#allocation27_spill]] (!%p1968_p0) }
  0x61   : > { %s962_s21 = scalar_lea.vmem %s3060_s25, %s2753_s9  ;;  %978 = sbr.rel (%p1968_p0) target bundleno = 230 (0xe6), region = 124 }
  0x62   : > { %s965_s6 = scalar_lea.vmem %s3061_s22, %s2753_s9 }
  0x63   : > { %s968_s17 = scalar_lea.vmem %s3062_s0, %s2753_s9 }
  0x64   : > { %v2782_v0 = vld [vmem:[%s3063_s12] sm:$0xff]  ;;  %v2787_v1 = vld [vmem:[%s3063_s12 + $0x8] sm:$0xff] }
  0x65   : > { %s971_s3 = scalar_lea.vmem %s3064_s24, %s2753_s9 }
  0x66   : > { %v2460_v2 = vmov 0   ;;  %s3066_s22 = smov %s3065_s28  ;;  %v979_v3 = vld [vmem:[%s3065_s28] sm:$0xff]  ;;  %vm993_vm0 = vcmask 261120  }
  0x67   : > { %2108 = vset.pattern.permute.xlu0 %v2460_v2  ;;  %v980_v6 = vld [vmem:[%s3066_s22 + $0x8] sm:$0xff] }
  0x68   : > { %983 = vperm.xlu0 %2108, %v2782_v0  }
  0x70   : > { %988 = vperm.xlu0 %2108, %v2787_v1  }
  0xda   : > { %v984_v4 = vpop.permute.xlu0 %983 }
  0xdb   : > { %v991_v5 = vmul.f32 %v984_v4, %v979_v3 }
  0xdd   : > { %994 = vst.msk [vmem:[#allocation2] sm:$0xff] %vm993_vm0, %v991_v5 }
  0xe2   : > { %v989_v7 = vpop.permute.xlu0 %988 }
  0xe3   : > { %v992_v8 = vmul.f32 %v989_v7, %v980_v6 }
  0xe5   : > { %995 = vst.msk [vmem:[#allocation2 + $0x8] sm:$0xff] %vm993_vm0, %v992_v8 }
  0xe6 PF: > { %vm1000_vm1 = vcmask 261120   ;;  %v2808_v11 = vld [vmem:[#allocation2] sm:$0xff]  ;;  %v2461_v13 = vmov 32.0   ;;  %v1065_v30 = vld [vmem:[%s2730_s13 + $0x18] sm:$0xff]  ;;  %v1062_v33 = vld [vmem:[%s2730_s13] sm:$0xff]  ;;  %s3067_s20 = sld [smem:[#allocation29_spill]] }
  0xe7   : > { %v1001_v12 = vsel %vm1000_vm1, %v2808_v11, 0.0  ;;  %2120 = vrcp.f32 %v2461_v13  ;;  %2001 = vmatpush.msra.mxu1 %v1065_v30  ;;  %1088 = vmatpush.msra.mxu0 %v1065_v30  ;;  %v1064_v31 = vld [vmem:[%s2730_s13 + $0x10] sm:$0xff]  ;;  %v1063_v32 = vld [vmem:[%s2730_s13 + $0x8] sm:$0xff]  ;;  %v1102_v34 = vld [vmem:[%s2736_s15 + $0x18] sm:$0xff]  ;;  %s3069_s18 = scalar_lea.vmem [#allocation3], %s2720_s4  ;;  %vm1136_vm9 = vcmask 130048  }
  0xe8   : > { %v1101_v35 = vld [vmem:[%s2736_s15 + $0x10] sm:$0xff]  ;;  %v1100_v36 = vld [vmem:[%s2736_s15 + $0x8] sm:$0xff]  ;;  %v1099_v39 = vld [vmem:[%s2736_s15] sm:$0xff]  ;;  %s2462_s11 = smov 112   ;;  %vm1189_vm10 = vcmask 64512   ;;  %s2465_s14 = smov 16  }
  0xe9   : > { %2002 = vmatpush.msra.mxu1 %v1064_v31  ;;  %1089 = vmatpush.msra.mxu0 %v1064_v31  ;;  %v2112_v56 = vld [vmem:[%s3069_s18] ss:$0 sm:$0xff]  ;;  %p1991_p1 = scmp.ne.s32.totalorder %s2448_s30, 1 }
  0xea   : > { %v2114_v5 = vld [vmem:[%s959_s27] ss:$0 sm:$0xff]  ;;  %s2464_s27 = smov 80   ;;  %s3078_s29 = sld [smem:[#allocation44_spill]] (!%p1991_p1) }
  0xeb   : > { %2003 = vmatpush.msra.mxu1 %v1063_v32  ;;  %1090 = vmatpush.msra.mxu0 %v1063_v32 }
  0xec   : > { %v2804_v9 = vld [vmem:[#allocation2 + $0x8] sm:$0xff]  ;;  %s3068_s25 = scalar_lea.vmem %s3067_s20, %s2753_s9 }
  0xed   : > { %v1004_v10 = vsel %vm1000_vm1, %v2804_v9, 0.0  ;;  %v2121_v14 = vpop.eup %2120  ;;  %2004 = vmatpush.msra.mxu1 %v1062_v33  ;;  %1091 = vmatpush.msra.mxu0 %v1062_v33  ;;  %v2111_v52 = vld [vmem:[%s3068_s25] ss:$0 sm:$0xff] }
  0xee   : > { %1005 = vadd.xlane.f32.xlu0 %v1004_v10  ;;  %v1008_v15 = vmul.f32 32.0, %v2121_v14  ;;  %vm1012_vm2 = vweird.f32 %v2121_v14  ;;  %v2113_v10 = vld [vmem:[%s956_s16] ss:$0 sm:$0xff]  ;;  %s2463_s16 = smov 96  }
  0xef   : > { %1125 = vmatpush.msrb.mxu1 %v1102_v34 }
  0xf0   : > { %v1009_v16 = vsub.f32 1.0, %v1008_v15 }
  0xf1   : > { %1126 = vmatpush.msrb.mxu1 %v1101_v35 }
  0xf2   : > { %v1010_v17 = vmul.f32 %v2121_v14, %v1009_v16 }
  0xf3   : > { %1127 = vmatpush.msrb.mxu1 %v1100_v36 }
  0xf4   : > { %v1011_v18 = vadd.f32 %v2121_v14, %v1010_v17 }
  0xf5   : > { %1128 = vmatpush.msrb.mxu1 %v1099_v39 }
  0xf6   : > { %1002 = vadd.xlane.f32.xlu0 %v1001_v12  ;;  %v2812_v19 = vsel %vm1012_vm2, %v2121_v14, %v1011_v18 }
 0x161   : > { %v1006_v20 = vpop.xlane.xlu0 %1005 }
 0x162   : > { %v1015_v21 = vmul.f32 %v2812_v19, %v1006_v20 }
 0x164   : > { %v1017_v22 = vsub.f32 %v2804_v9, %v1015_v21 }
 0x166   : > { %v1019_v23 = vmul.f32 %v1017_v22, %v1017_v22 }
 0x168   : > { %v1023_v24 = vsel %vm1000_vm1, %v1019_v23, 0.0 }
 0x169   : > { %1024 = vadd.xlane.f32.xlu1 %v1023_v24  ;;  %v1003_v25 = vpop.xlane.xlu0 %1002 }
 0x16a   : > { %v1014_v26 = vmul.f32 %v2812_v19, %v1003_v25 }
 0x16c   : > { %v1016_v27 = vsub.f32 %v2808_v11, %v1014_v26 }
 0x16e   : > { %v1018_v28 = vmul.f32 %v1016_v27, %v1016_v27 }
 0x170   : > { %v1020_v29 = vsel %vm1000_vm1, %v1018_v28, 0.0 }
 0x171   : > { %1021 = vadd.xlane.f32.xlu1 %v1020_v29 }
 0x1dc   : > { %v1025_v37 = vpop.xlane.xlu1 %1024 }
 0x1dd   : > { %v1027_v38 = vmul.f32 %v1025_v37, %v2812_v19 }
 0x1df   : > { %v1029_v40 = vadd.f32 1e-08, %v1027_v38 }
 0x1e1   : > { %2122 = vrsqrt.f32 %v1029_v40  ;;  %vm1046_vm4 = vweird.f32 %v1029_v40 }
 0x1e4   : > { %v1022_v41 = vpop.xlane.xlu1 %1021 }
 0x1e5   : > { %v1026_v42 = vmul.f32 %v1022_v41, %v2812_v19 }
 0x1e7   : > { %v2123_v43 = vpop.eup %2122  ;;  %v1028_v44 = vadd.f32 1e-08, %v1026_v42 }
 0x1e8   : > { %v1041_v45 = vmul.f32 %v2123_v43, %v1029_v40  ;;  %vm1047_vm3 = vweird.f32 %v2123_v43 }
 0x1e9   : > { %2124 = vrsqrt.f32 %v1028_v44  ;;  %vm1048_vm5 = vmor %vm1046_vm4, %vm1047_vm3  ;;  %vm1036_vm7 = vweird.f32 %v1028_v44 }
 0x1ea   : > { %v1042_v46 = vmul.f32 %v2123_v43, %v1041_v45 }
 0x1ec   : > { %v1043_v47 = vmul.f32 0.5, %v1042_v46 }
 0x1ee   : > { %v1044_v48 = vsub.f32 1.5, %v1043_v47 }
 0x1ef   : > { %v2125_v49 = vpop.eup %2124 }
 0x1f0   : > { %v1045_v50 = vmul.f32 %v2123_v43, %v1044_v48  ;;  %v1031_v51 = vmul.f32 %v2125_v49, %v1028_v44  ;;  %vm1037_vm6 = vweird.f32 %v2125_v49 }
 0x1f1   : > { %vm1038_vm8 = vmor %vm1036_vm7, %vm1037_vm6 }
 0x1f2   : > { %v1049_v53 = vsel %vm1048_vm5, %v2123_v43, %v1045_v50  ;;  %v1032_v54 = vmul.f32 %v2125_v49, %v1031_v51 }
 0x1f3   : > { %v1051_v55 = vmul.f32 %v1049_v53, %v1017_v22 }
 0x1f4   : > { %v1033_v57 = vmul.f32 0.5, %v1032_v54 }
 0x1f5   : > { %v1056_v58 = vmul.f32 %v2111_v52, %v1051_v55 }
 0x1f6   : > { %v1034_v59 = vsub.f32 1.5, %v1033_v57 }
 0x1f7   : > { %v2837_v60 = vadd.f32 %v2112_v56, %v1056_v58 }
 0x1f8   : > { %v1035_v61 = vmul.f32 %v2125_v49, %v1034_v59 }
 0x1f9   : > { %1970 = vmatmul.msk.f32.vlgmr.msra.gmra.mxu1 %vm1000_vm1, %v2837_v60 }
 0x1fa   : > { %v1039_v62 = vsel %vm1038_vm8, %v2125_v49, %v1035_v61 }
 0x1fb   : > { %v1050_v63 = vmul.f32 %v1039_v62, %v1016_v27 }
 0x1fd   : > { %v1055_v2 = vmul.f32 %v2111_v52, %v1050_v63 }
 0x1ff   : > { %v2841_v3 = vadd.f32 %v2112_v56, %v1055_v2 }
 0x201   : > { %1969 = vmatmul.msk.f32.vlgmr.msra.gmra.mxu0 %vm1000_vm1, %v2841_v3  ;;  %1971 = vmatmul.msk.f32.vlgmr.msrb.gmra.mxu1 %vm1000_vm1, %v2808_v11 }
 0x209   : > { %1972 = vmatmul.msk.f32.gmra.mxu1 %vm1000_vm1, %v2804_v9 }
 0x276   : > { %v1096_v4 = vpop.f32.mrf.mxu1 }
 0x277   : > { %v1097_v13 = vadd.f32 %v2113_v10, %v1096_v4 }
 0x27e   : > { %v1130_v6 = vpop.f32.mrf.mxu1  ;;  %v1093_v7 = vpop.f32.mrf.mxu0 }
 0x27f   : > { %v2854_v8 = vadd.f32 %v2114_v5, %v1130_v6  ;;  %v1094_v9 = vadd.f32 %v2113_v10, %v1093_v7  ;;  %v1406_v6 = vld [vmem:[%s2738_s26 + $0x10] sm:$0xff]  ;;  %v1405_v7 = vld [vmem:[%s2738_s26 + $0x8] sm:$0xff] }
 0x281   : > { %1973 = vmatpush.xpose.msk.msra.mxu2 %vm1136_vm9, %v2854_v8  ;;  %1266 = vrot.lane.b32.xlu0 %v2854_v8, %s2462_s11 }
 0x284   : > { %1974 = vmatmul.msk.f32.vlgmr.msra.gmra.mxu2 %vm1136_vm9, %v1094_v9 }
 0x286   : > { %v1133_v11 = vpop.f32.mrf.mxu1 }
 0x287   : > { %v2866_v12 = vadd.f32 %v2114_v5, %v1133_v11  ;;  %v1407_v5 = vld [vmem:[%s2738_s26 + $0x18] sm:$0xff] }
 0x289   : > { %1975 = vmatpush.xpose.msk.msra.mxu3 %vm1136_vm9, %v2866_v12 }
 0x28c   : > { %1976 = vmatmul.msk.f32.vlgmr.msra.gmra.mxu3 %vm1136_vm9, %v1097_v13 }
 0x2f3   : > { %v1267_v28 = vpop.permute.xlu0 %1266 }
 0x307   : > { %v1160_v14 = vpop.f32.mrf.mxu2 }
 0x308   : > { %v1190_v15 = vsel %vm1189_vm10, %v1160_v14, -inf }
 0x309   : > { %1191 = vmax.xlane.f32.xlu2 %v1190_v15  ;;  %v2115_v15 = vld [vmem:[%s962_s21] ss:$0 sm:$0xff] }
 0x30f   : > { %v1186_v16 = vpop.f32.mrf.mxu3 }
 0x310   : > { %v1193_v17 = vsel %vm1189_vm10, %v1186_v16, -inf }
 0x311   : > { %1194 = vmax.xlane.f32.xlu2 %v1193_v17 }
 0x329   : > { %1212 = vrot.lane.b32.xlu2 %v2854_v8, %s2463_s16 }
 0x331   : > { %1264 = vrot.lane.b32.xlu2 %v1094_v9, %s2462_s11  ;;  %v1404_v9 = vld [vmem:[%s2738_s26] sm:$0xff] }
 0x339   : > { %1292 = vrot.lane.b32.xlu2 %v1097_v13, %s2462_s11 }
 0x37c   : > { %v1192_v18 = vpop.xlane.xlu2 %1191 }
 0x37d   : > { %v1196_v20 = vsub.f32 %v1160_v14, %v1192_v18 }
 0x37f   : > { %v1198_v21 = vmul.f32 1.442695, %v1196_v20 }
 0x381   : > { %2126 = vpow2.f32 %v1198_v21 }
 0x384   : > { %v1195_v22 = vpop.xlane.xlu2 %1194 }
 0x385   : > { %v1197_v23 = vsub.f32 %v1186_v16, %v1195_v22 }
 0x387   : > { %v2127_v24 = vpop.eup %2126  ;;  %v1200_v25 = vmul.f32 1.442695, %v1197_v23 }
 0x388   : > { %v1202_v26 = vsel %vm1189_vm10, %v2127_v24, 0.0 }
 0x389   : > { %2128 = vpow2.f32 %v1200_v25  ;;  %1203 = vadd.xlane.f32.xlu0 %v1202_v26 }
 0x38c   : > { %v1213_v27 = vpop.permute.xlu2 %1212 }
 0x38d   : > { %1233 = vmatpush.msrb.mxu2 %v1213_v27 }
 0x38f   : > { %1979 = vmatpush.xpose.msk.msra.mxu2 %vm1136_vm9, %v1267_v28  ;;  %v2129_v29 = vpop.eup %2128 }
 0x390   : > { %v1205_v30 = vsel %vm1189_vm10, %v2129_v29, 0.0 }
 0x391   : > { %1206 = vadd.xlane.f32.xlu1 %v1205_v30 }
 0x394   : > { %v1265_v34 = vpop.permute.xlu2 %1264 }
 0x39c   : > { %v1293_v40 = vpop.permute.xlu2 %1292 }
 0x39d   : > { %1294 = vrot.lane.b32.xlu0 %v2866_v12, %s2462_s11 }
 0x3aa   : > { %1238 = vrot.lane.b32.xlu1 %v2866_v12, %s2463_s16 }
 0x3fc   : > { %v1204_v31 = vpop.xlane.xlu0 %1203 }
 0x3fd   : > { %2130 = vrcp.f32 %v1204_v31 }
 0x403   : > { %v2131_v32 = vpop.eup %2130 }
 0x404   : > { %v1210_v33 = vmul.f32 %v2131_v32, %v2127_v24  ;;  %v1207_v35 = vpop.xlane.xlu1 %1206 }
 0x405   : > { %2132 = vrcp.f32 %v1207_v35  ;;  %v1500_v35 = vld [vmem:[%s2745_s10 + $0x8] sm:$0xff] }
 0x406   : > { %1977 = vmatmul.msk.f32.vlgmr.msrb.gmra.mxu2 %vm1189_vm10, %v1210_v33  ;;  %v1502_v33 = vld [vmem:[%s2745_s10 + $0x18] sm:$0xff] }
 0x407   : > { %1430 = vmatpush.msrb.mxu2 %v1407_v5 }
 0x409   : > { %1431 = vmatpush.msrb.mxu2 %v1406_v6  ;;  %v1540_v6 = vld [vmem:[%s2793_s7 + $0x10] sm:$0xff] }
 0x40b   : > { %v2133_v36 = vpop.eup %2132  ;;  %1432 = vmatpush.msrb.mxu2 %v1405_v7  ;;  %v1539_v7 = vld [vmem:[%s2793_s7 + $0x8] sm:$0xff] }
 0x40c   : > { %v1211_v38 = vmul.f32 %v2133_v36, %v2129_v29  ;;  %v1499_v36 = vld [vmem:[%s2745_s10] sm:$0xff] }
 0x40d   : > { %1433 = vmatpush.msrb.mxu2 %v1404_v9  ;;  %v2118_v9 = vld [vmem:[%s968_s17] ss:$0 sm:$0xff]  ;;  %s3077_s17 = sld [smem:[#allocation43_spill]] (!%p1991_p1) }
 0x40e   : > { %1980 = vmatmul.msk.f32.vlgmr.msra.gmra.mxu2 %vm1136_vm9, %v1265_v34  ;;  %v1501_v34 = vld [vmem:[%s2745_s10 + $0x10] sm:$0xff]  ;;  %s3074_s10 = scalar_lea.vmem [#allocation11], %s2720_s4 }
 0x40f   : > { %v1295_v39 = vpop.permute.xlu0 %1294 }
 0x41c   : > { %v1239_v37 = vpop.permute.xlu1 %1238 }
 0x41d   : > { %1259 = vmatpush.msrb.mxu3 %v1239_v37 }
 0x41e   : > { %1978 = vmatmul.msk.f32.vlgmr.msrb.gmra.mxu3 %vm1189_vm10, %v1211_v38 }
 0x41f   : > { %1981 = vmatpush.xpose.msk.msra.mxu3 %vm1136_vm9, %v1295_v39 }
 0x423   : > { %1525 = vmatpush.msrb.mxu3 %v1502_v33 }
 0x425   : > { %1526 = vmatpush.msrb.mxu3 %v1501_v34 }
 0x426   : > { %1982 = vmatmul.msk.f32.vlgmr.msra.gmra.mxu3 %vm1136_vm9, %v1293_v40 }
 0x427   : > { %1527 = vmatpush.msrb.mxu3 %v1500_v35 }
 0x429   : > { %1528 = vmatpush.msrb.mxu3 %v1499_v36 }
 0x489   : > { %v1235_v41 = vpop.f32.mrf.mxu2 }
 0x491   : > { %v1289_v42 = vpop.f32.mrf.mxu2 }
 0x492   : > { %v1320_v43 = vsel %vm1189_vm10, %v1289_v42, -inf }
 0x493   : > { %1321 = vmax.xlane.f32.xlu1 %v1320_v43 }
 0x4a1   : > { %v1261_v44 = vpop.f32.mrf.mxu3 }
 0x4a9   : > { %v1317_v45 = vpop.f32.mrf.mxu3 }
 0x4aa   : > { %v1323_v46 = vsel %vm1189_vm10, %v1317_v45, -inf }
 0x4ab   : > { %1324 = vmax.xlane.f32.xlu0 %v1323_v46  ;;  %v2116_v46 = vld [vmem:[%s965_s6] ss:$0 sm:$0xff] }
 0x4bf   : > { %1342 = vrot.lane.b32.xlu0 %v2854_v8, %s2464_s27 }
 0x506   : > { %v1322_v47 = vpop.xlane.xlu1 %1321 }
 0x507   : > { %v1326_v48 = vsub.f32 %v1289_v42, %v1322_v47  ;;  %v1541_v47 = vld [vmem:[%s2793_s7 + $0x18] sm:$0xff] }
 0x509   : > { %v1328_v49 = vmul.f32 1.442695, %v1326_v48 }
 0x50b   : > { %2134 = vpow2.f32 %v1328_v49 }
 0x511   : > { %v2135_v50 = vpop.eup %2134 }
 0x512   : > { %v1332_v51 = vsel %vm1189_vm10, %v2135_v50, 0.0 }
 0x513   : > { %1333 = vadd.xlane.f32.xlu2 %v1332_v51 }
 0x51e   : > { %v1325_v52 = vpop.xlane.xlu0 %1324 }
 0x51f   : > { %v1327_v53 = vsub.f32 %v1317_v45, %v1325_v52 }
 0x521   : > { %v1330_v54 = vmul.f32 1.442695, %v1327_v53 }
 0x523   : > { %2136 = vpow2.f32 %v1330_v54 }
 0x529   : > { %v2137_v55 = vpop.eup %2136 }
 0x52a   : > { %v1335_v56 = vsel %vm1189_vm10, %v2137_v55, 0.0 }
 0x52b   : > { %1368 = vrot.lane.b32.xlu2 %v2866_v12, %s2464_s27  ;;  %1336 = vadd.xlane.f32.xlu1 %v1335_v56 }
 0x531   : > { %v1343_v57 = vpop.permute.xlu0 %1342 }
 0x532   : > { %1363 = vmatpush.msrb.mxu0 %v1343_v57 }
 0x534   : > { %1564 = vmatpush.msra.mxu0 %v1541_v47 }
 0x536   : > { %1565 = vmatpush.msra.mxu0 %v1540_v6 }
 0x538   : > { %1566 = vmatpush.msra.mxu0 %v1539_v7 }
 0x586   : > { %v1334_v58 = vpop.xlane.xlu2 %1333 }
 0x587   : > { %2138 = vrcp.f32 %v1334_v58 }
 0x58d   : > { %v2139_v59 = vpop.eup %2138 }
 0x58e   : > { %v1369_v61 = vpop.permute.xlu2 %1368  ;;  %v1340_v62 = vmul.f32 %v2139_v59, %v2135_v50  ;;  %v2117_v50 = vld [vmem:[%s3074_s10] ss:$0 sm:$0xff] }
 0x58f   : > { %1389 = vmatpush.msra.mxu1 %v1369_v61 }
 0x590   : > { %1983 = vmatmul.msk.f32.vlgmr.msrb.gmra.mxu0 %vm1189_vm10, %v1340_v62 }
 0x59e   : > { %v1337_v63 = vpop.xlane.xlu1 %1336 }
 0x59f   : > { %2140 = vrcp.f32 %v1337_v63 }
 0x5a5   : > { %v2141_v2 = vpop.eup %2140 }
 0x5a6   : > { %v1341_v4 = vmul.f32 %v2141_v2, %v2137_v55 }
 0x5a8   : > { %1984 = vmatmul.msk.f32.vlgmr.msra.gmra.mxu1 %vm1189_vm10, %v1341_v4 }
 0x60d   : > { %v1365_v8 = vpop.f32.mrf.mxu0 }
 0x60e   : > { %1396 = vrot.lane.b32.xlu1 %v1365_v8, %s2465_s14  ;;  %v1538_v8 = vld [vmem:[%s2793_s7] sm:$0xff] }
 0x60f   : > { %1567 = vmatpush.msra.mxu0 %v1538_v8 }
 0x625   : > { %v1391_v10 = vpop.f32.mrf.mxu1 }
 0x626   : > { %1398 = vrot.lane.b32.xlu0 %v1391_v10, %s2465_s14  ;;  %v2466_v10 = vmov 0  }
 0x627   : > { %2109 = vset.pattern.permute.xlu0 %v2466_v10  ;;  %2110 = vset.pattern.permute.xlu1 %v2466_v10 }
 0x680   : > { %v1397_v11 = vpop.permute.xlu1 %1396 }
 0x681   : > { %v1402_v12 = vsel %vm1136_vm9, %v1235_v41, %v1397_v11 }
 0x682   : > { %1985 = vmatmul.msk.f32.vlgmr.msrb.gmra.mxu2 %vm1000_vm1, %v1402_v12 }
 0x698   : > { %v1399_v13 = vpop.permute.xlu0 %1398 }
 0x699   : > { %v1403_v14 = vsel %vm1136_vm9, %v1261_v44, %v1399_v13 }
 0x69a   : > { %1986 = vmatmul.msk.f32.gmra.mxu2 %vm1000_vm1, %v1403_v14 }
 0x705   : > { %v1435_v16 = vpop.f32.mrf.mxu2 }
 0x706   : > { %v1436_v17 = vadd.f32 %v2115_v15, %v1435_v16 }
 0x708   : > { %v1441_v18 = vadd.f32 %v1436_v17, %v2841_v3 }
 0x70a   : > { %v1445_v20 = vsel %vm1000_vm1, %v1441_v18, 0.0 }
 0x70b   : > { %1446 = vadd.xlane.f32.xlu2 %v1445_v20 }
 0x71d   : > { %v1438_v21 = vpop.f32.mrf.mxu2 }
 0x71e   : > { %v1439_v22 = vadd.f32 %v2115_v15, %v1438_v21 }
 0x720   : > { %v1442_v23 = vadd.f32 %v1439_v22, %v2837_v60 }
 0x722   : > { %v1448_v24 = vsel %vm1000_vm1, %v1442_v23, 0.0 }
 0x723   : > { %1449 = vadd.xlane.f32.xlu0 %v1448_v24 }
 0x737   : > { %1579 = vperm.xlu0 %2109, %v2782_v0   ;;  %v2119_v0 = vld [vmem:[%s971_s3] ss:$0 sm:$0xff] }
 0x77e   : > { %v1447_v25 = vpop.xlane.xlu2 %1446 }
 0x77f   : > { %v1451_v26 = vmul.f32 %v1447_v25, %v2812_v19 }
 0x781   : > { %v1453_v27 = vsub.f32 %v1441_v18, %v1451_v26 }
 0x783   : > { %v1455_v28 = vmul.f32 %v1453_v27, %v1453_v27 }
 0x785   : > { %v1457_v3 = vsel %vm1000_vm1, %v1455_v28, 0.0 }
 0x786   : > { %1458 = vadd.xlane.f32.xlu1 %v1457_v3 }
 0x796   : > { %v1450_v29 = vpop.xlane.xlu0 %1449 }
 0x797   : > { %v1452_v30 = vmul.f32 %v1450_v29, %v2812_v19 }
 0x799   : > { %v1454_v31 = vsub.f32 %v1442_v23, %v1452_v30 }
 0x79b   : > { %v1456_v32 = vmul.f32 %v1454_v31, %v1454_v31 }
 0x79d   : > { %v1460_v60 = vsel %vm1000_vm1, %v1456_v32, 0.0 }
 0x79e   : > { %1461 = vadd.xlane.f32.xlu2 %v1460_v60 }
 0x79f   : > { %1584 = vperm.xlu1 %2110, %v2787_v1  }
 0x7a9   : > { %v1580_v18 = vpop.permute.xlu0 %1579 }
 0x7f9   : > { %v1459_v37 = vpop.xlane.xlu1 %1458 }
 0x7fa   : > { %v1463_v38 = vmul.f32 %v1459_v37, %v2812_v19 }
 0x7fc   : > { %v1465_v39 = vadd.f32 1e-08, %v1463_v38 }
 0x7fe   : > { %2142 = vrsqrt.f32 %v1465_v39  ;;  %vm1473_vm12 = vweird.f32 %v1465_v39 }
 0x804   : > { %v2143_v40 = vpop.eup %2142 }
 0x805   : > { %v1468_v41 = vmul.f32 %v2143_v40, %v1465_v39  ;;  %vm1474_vm11 = vweird.f32 %v2143_v40 }
 0x806   : > { %vm1475_vm13 = vmor %vm1473_vm12, %vm1474_vm11 }
 0x807   : > { %v1469_v42 = vmul.f32 %v2143_v40, %v1468_v41 }
 0x809   : > { %v1470_v43 = vmul.f32 0.5, %v1469_v42 }
 0x80b   : > { %v1471_v44 = vsub.f32 1.5, %v1470_v43 }
 0x80d   : > { %v1472_v45 = vmul.f32 %v2143_v40, %v1471_v44 }
 0x80f   : > { %v1476_v48 = vsel %vm1475_vm13, %v2143_v40, %v1472_v45 }
 0x810   : > { %v1487_v49 = vmul.f32 %v1476_v48, %v1453_v27 }
 0x811   : > { %v1462_v51 = vpop.xlane.xlu2 %1461  ;;  %v1585_v24 = vpop.permute.xlu1 %1584 }
 0x812   : > { %v1492_v52 = vmul.f32 %v2116_v46, %v1487_v49  ;;  %v1464_v53 = vmul.f32 %v1462_v51, %v2812_v19 }
 0x814   : > { %v1466_v54 = vadd.f32 1e-08, %v1464_v53  ;;  %v1497_v55 = vadd.f32 %v2117_v50, %v1492_v52 }
 0x816   : > { %2144 = vrsqrt.f32 %v1466_v54  ;;  %1987 = vmatmul.msk.f32.vlgmr.msrb.gmra.mxu3 %vm1000_vm1, %v1497_v55  ;;  %vm1483_vm15 = vweird.f32 %v1466_v54 }
 0x81c   : > { %v2145_v56 = vpop.eup %2144 }
 0x81d   : > { %v1478_v57 = vmul.f32 %v2145_v56, %v1466_v54  ;;  %vm1484_vm14 = vweird.f32 %v2145_v56 }
 0x81e   : > { %vm1485_vm0 = vmor %vm1483_vm15, %vm1484_vm14 }
 0x81f   : > { %v1479_v58 = vmul.f32 %v2145_v56, %v1478_v57 }
 0x821   : > { %v1480_v59 = vmul.f32 0.5, %v1479_v58 }
 0x823   : > { %v1481_v61 = vsub.f32 1.5, %v1480_v59 }
 0x825   : > { %v1482_v62 = vmul.f32 %v2145_v56, %v1481_v61 }
 0x827   : > { %v1486_v63 = vsel %vm1485_vm0, %v2145_v56, %v1482_v62 }
 0x828   : > { %v1488_v2 = vmul.f32 %v1486_v63, %v1454_v31 }
 0x82a   : > { %v1493_v4 = vmul.f32 %v2116_v46, %v1488_v2 }
 0x82c   : > { %v1498_v5 = vadd.f32 %v2117_v50, %v1493_v4 }
 0x82e   : > { %1988 = vmatmul.msk.f32.gmra.mxu3 %vm1000_vm1, %v1498_v5 }
 0x899   : > { %v1530_v11 = vpop.f32.mrf.mxu3 }
 0x89a   : > { %v1531_v12 = vadd.f32 %v2118_v9, %v1530_v11 }
 0x89c   : > { %v1536_v13 = vmax.f32 %v1531_v12, 0.0 }
 0x89e   : > { %1989 = vmatmul.msk.f32.vlgmr.msra.gmra.mxu0 %vm1000_vm1, %v1536_v13 }
 0x8b1   : > { %v1533_v14 = vpop.f32.mrf.mxu3 }
 0x8b2   : > { %v1534_v15 = vadd.f32 %v2118_v9, %v1533_v14 }
 0x8b4   : > { %v1537_v16 = vmax.f32 %v1534_v15, 0.0 }
 0x8b6   : > { %1990 = vmatmul.msk.f32.gmra.mxu0 %vm1000_vm1, %v1537_v16 }
 0x91b   : > { %v1569_v1 = vpop.f32.mrf.mxu0 }
 0x91c   : > { %v1570_v17 = vadd.f32 %v2119_v0, %v1569_v1 }
 0x91e   : > { %v1575_v20 = vadd.f32 %v1570_v17, %v1497_v55 }
 0x920   : > { %v1587_v21 = vmul.f32 %v1580_v18, %v1575_v20 }
 0x922   : > { %1589 = vst.msk [vmem:[#allocation2] sm:$0xff] %vm1000_vm1, %v1587_v21 }
 0x933   : > { %v1572_v22 = vpop.f32.mrf.mxu0 }
 0x934   : > { %v1573_v23 = vadd.f32 %v2119_v0, %v1572_v22 }
 0x936   : > { %v1576_v25 = vadd.f32 %v1573_v23, %v1498_v5  ;;  %1594 = sbr.rel (%p1991_p1) target bundleno = 2640 (0xa50), region = 128 }
 0x938   : > { %v1588_v26 = vmul.f32 %v1585_v24, %v1576_v25 }
 0x93a   : > { %1590 = vst.msk [vmem:[#allocation2 + $0x8] sm:$0xff] %vm1000_vm1, %v1588_v26 }
 0x93b   : > { %v1597_v27 = vsel %vm1000_vm1, %v1587_v21, 0.0  ;;  %v1600_v28 = vsel %vm1000_vm1, %v1588_v26, 0.0  ;;  %v2146_v51 = vld [vmem:[%s3077_s17] ss:$0 sm:$0xff] }
 0x93c   : > { %1598 = vadd.xlane.f32.xlu0 %v1597_v27  ;;  %v2147_v54 = vld [vmem:[%s3078_s29] ss:$0 sm:$0xff] }
 0x944   : > { %1601 = vadd.xlane.f32.xlu0 %v1600_v28 }
 0x9af   : > { %v1599_v3 = vpop.xlane.xlu0 %1598 }
 0x9b0   : > { %v1603_v29 = vmul.f32 %v1599_v3, %v2812_v19 }
 0x9b2   : > { %v1605_v30 = vsub.f32 %v1587_v21, %v1603_v29 }
 0x9b4   : > { %v1607_v31 = vmul.f32 %v1605_v30, %v1605_v30 }
 0x9b6   : > { %v1609_v32 = vsel %vm1000_vm1, %v1607_v31, 0.0 }
 0x9b7   : > { %1610 = vadd.xlane.f32.xlu1 %v1609_v32  ;;  %v1602_v60 = vpop.xlane.xlu0 %1601 }
 0x9b8   : > { %v1604_v33 = vmul.f32 %v1602_v60, %v2812_v19 }
 0x9ba   : > { %v1606_v34 = vsub.f32 %v1588_v26, %v1604_v33 }
 0x9bc   : > { %v1608_v35 = vmul.f32 %v1606_v34, %v1606_v34 }
 0x9be   : > { %v1612_v36 = vsel %vm1000_vm1, %v1608_v35, 0.0 }
 0x9bf   : > { %1613 = vadd.xlane.f32.xlu1 %v1612_v36 }
 0xa2a   : > { %v1611_v37 = vpop.xlane.xlu1 %1610 }
 0xa2b   : > { %v1615_v38 = vmul.f32 %v1611_v37, %v2812_v19 }
 0xa2d   : > { %v1617_v39 = vadd.f32 1e-08, %v1615_v38 }
 0xa2f   : > { %2148 = vrsqrt.f32 %v1617_v39  ;;  %vm1625_vm3 = vweird.f32 %v1617_v39 }
 0xa32   : > { %v1614_v40 = vpop.xlane.xlu1 %1613 }
 0xa33   : > { %v1616_v41 = vmul.f32 %v1614_v40, %v2812_v19 }
 0xa35   : > { %v2149_v42 = vpop.eup %2148  ;;  %v1618_v43 = vadd.f32 1e-08, %v1616_v41 }
 0xa36   : > { %v1620_v44 = vmul.f32 %v2149_v42, %v1617_v39  ;;  %vm1626_vm2 = vweird.f32 %v2149_v42 }
 0xa37   : > { %2150 = vrsqrt.f32 %v1618_v43  ;;  %vm1627_vm4 = vmor %vm1625_vm3, %vm1626_vm2  ;;  %vm1635_vm6 = vweird.f32 %v1618_v43 }
 0xa38   : > { %v1621_v45 = vmul.f32 %v2149_v42, %v1620_v44 }
 0xa3a   : > { %v1622_v46 = vmul.f32 0.5, %v1621_v45 }
 0xa3c   : > { %v1623_v47 = vsub.f32 1.5, %v1622_v46 }
 0xa3d   : > { %v2151_v48 = vpop.eup %2150 }
 0xa3e   : > { %v1624_v49 = vmul.f32 %v2149_v42, %v1623_v47  ;;  %v1630_v50 = vmul.f32 %v2151_v48, %v1618_v43  ;;  %vm1636_vm5 = vweird.f32 %v2151_v48 }
 0xa3f   : > { %vm1637_vm7 = vmor %vm1635_vm6, %vm1636_vm5 }
 0xa40   : > { %v1628_v52 = vsel %vm1627_vm4, %v2149_v42, %v1624_v49  ;;  %v1631_v53 = vmul.f32 %v2151_v48, %v1630_v50 }
 0xa41   : > { %v1639_v19 = vmul.f32 %v1628_v52, %v1605_v30 }
 0xa42   : > { %v1632_v55 = vmul.f32 0.5, %v1631_v53 }
 0xa43   : > { %v1644_v56 = vmul.f32 %v2146_v51, %v1639_v19 }
 0xa44   : > { %v1633_v57 = vsub.f32 1.5, %v1632_v55 }
 0xa45   : > { %v1649_v58 = vadd.f32 %v2147_v54, %v1644_v56 }
 0xa46   : > { %v1634_v59 = vmul.f32 %v2151_v48, %v1633_v57 }
 0xa47   : > { %1651 = vst.msk [vmem:[#allocation15] sm:$0xff] %vm1000_vm1, %v1649_v58 }
 0xa48   : > { %v1638_v61 = vsel %vm1637_vm7, %v2151_v48, %v1634_v59 }
 0xa49   : > { %v1640_v62 = vmul.f32 %v1638_v61, %v1606_v34 }
 0xa4b   : > { %v1645_v63 = vmul.f32 %v2146_v51, %v1640_v62 }
 0xa4d   : > { %v1650_v2 = vadd.f32 %v2147_v54, %v1645_v63 }
 0xa4f   : > { %1652 = vst.msk [vmem:[#allocation15 + $0x8] sm:$0xff] %vm1000_vm1, %v1650_v2 }
 0xa50 PF: > { %p2046_p2 = scmp.eq.s32.totalorder %s2594_s1, 1  ;;  %s3079_s8 = sld [smem:[#allocation45_spill]] }
 0xa51   : > { %s2467_s24 = smov [#allocation15]   ;;  %s2468_s16 = smov 128  }
 0xa52   : > { %s1661_s11 = sshll.u32 %s2467_s24, 4  ;;  %s2469_s27 = smov 8   ;;  %s1662_s11 = int_to_ptr.vmem [resolvable:$true] %s1661_s11 }
 0xa56   : > { %s1663_s23 = sshll.u32 %s3079_s8, 4  ;;  %s1664_s23 = int_to_ptr.hbm [resolvable:$true] %s1663_s23 }
 0xa57   : > { %2020 = dma.vmem_to_hbm [thread:$0]  (%p2046_p2), %s1662_s11, 256, %s1664_s23, [#allocation5], %s2468_s16, %s2468_s16, %s2469_s27  }
 0xa58   : > { %2431 = dma.done.wait (%p2046_p2), [#allocation5], 256  }
 0xa59   : > { %2433 = vsyncadd (%p2046_p2), [#allocation5], 4294967040 }
 0xa5a PF: > { %s3080_s14 = sld [smem:[#allocation24_spill]] }
 0xa5b   : > { %s3081_s27 = sld [smem:[#allocation21_spill]] }
 0xa5c   : > { %s3082_s28 = sld [smem:[#allocation22_spill]] }
 0xa5d   : > { %s3083_s29 = sld [smem:[#allocation26_spill]] }
 0xa5e   : > { %s3084_s30 = sld [smem:[#allocation23_spill]] }
 0xa5f   : > { %s3085_s0 = sld [smem:[#allocation25_spill]] }
 0xa60   : > { %s41_s19 = sadd.s32 1, %s3080_s14  }
 0xa61   : > { %p38_p3 = scmp.ge.s32.totalorder %s41_s19, 4  }
 0xa63   :  { %40 = sbr.rel (!%p38_p3) target bundleno = 31 (0x1f), region = 237 }
 0xa68   :  { %1680 = vsyncpa [#allocation4], 1 }
 0xa69   :  { %1682 = vsyncpa [#allocation4 + $0x1], 1 }
 0xa6a   :  { %1683 = vsyncpa [#allocation7], 1 }
 0xa6b   :  { %1685 = vsyncpa [#allocation7 + $0x1], 1 }
 0xa6c   :  { %1686 = vsyncpa [#allocation10], 1 }
 0xa6d   :  { %1688 = vsyncpa [#allocation10 + $0x1], 1 }
 0xa6e   :  { %1689 = vsyncpa [#allocation13], 1 }
 0xa6f   :  { %1691 = vsyncpa [#allocation13 + $0x1], 1 }
 0xa70   :  { %1692 = vsyncpa [#allocation5], 1 }
 0xa71   :  { %1694 = vsyncpa [#allocation5 + $0x1], 1 }

</bundles_post_ra>
